<compile_context>
chip_gen: v6e
topology: v6e:2x2x1
jax: 0.10.0
libtpu: 0.0.40
codegen_flags: <defaults>
</compile_context>

<pallas_src>
import functools

import jax
import jax.numpy as jnp
from jax import lax
from jax.experimental import pallas as pl
from jax.experimental.pallas import tpu as pltpu

_HIDDEN = 128       # trunk / Q hidden width (fixed by the module)
_OUT_LANES = 128    # lane-dense packed output width


def _leaky_relu(x, slope):
    return jnp.where(x > 0, x, slope * x)


def infogan_disc_kernel(
    x_ref,                    # [TB, data_dim]            (mxu_dtype)
    w1_ref, b1_ref,           # [data_dim, 128], [1, 128] (trunk linear 1)
    w2_ref, b2_ref,           # [128, 128],      [1, 128] (trunk linear 2)
    wh_ref, bh_ref,           # [128, 256],      [1, 256] (fused Q-hidden | GAN head)
    wq_ref, bq_ref,           # [128, 128],      [1, 128] (Q out, discrete cols only)
    out_ref,                  # [TB, 128] packed: lanes [0,d)=q_discrete, lane d=gan
    *, slope, d,
):
    f32 = jnp.float32
    x = x_ref[...]

    # ---- discriminator trunk ----
    h = jnp.dot(x, w1_ref[...], preferred_element_type=f32) + b1_ref[...]
    h = _leaky_relu(h, slope)
    h = jnp.dot(h.astype(w2_ref.dtype), w2_ref[...],
                preferred_element_type=f32) + b2_ref[...]
    # (no activation after the 2nd trunk Linear -- matches the PyTorch module)

    # ---- fused heads: lanes 0..127 = Q hidden pre-act, lane 128 = GAN logit ----
    heads = jnp.dot(h.astype(wh_ref.dtype), wh_ref[...],
                    preferred_element_type=f32) + bh_ref[...]
    q1 = _leaky_relu(heads[:, :_HIDDEN], slope)
    g = heads[:, _HIDDEN:_HIDDEN + 1]                       # [TB, 1] GAN logit

    # ---- Q output (discrete columns only, zero-padded to 128 lanes) ----
    q = jnp.dot(q1.astype(wq_ref.dtype), wq_ref[...],
                preferred_element_type=f32) + bq_ref[...]   # [TB, 128]

    # sigmoid via EUP exp + approximate EUP reciprocal (keeps the VALU slot free)
    gan = pl.reciprocal(1.0 + jnp.exp(-g), approx=True)     # [TB, 1]

    # pack: gan goes into lane d, q_discrete already occupies lanes [0, d)
    lane = lax.broadcasted_iota(jnp.int32, out_ref.shape, 1)
    out_ref[...] = jnp.where(lane == d, gan, q)


def infogan_discriminator(x, params, discrete_code_dim, *,
                          batch_tile=512, mxu_dtype=jnp.float32, slope=0.1):
    """Returns (regular_gan_out [B,1], q_discrete [B,d]) like the PyTorch module."""
    B, data_dim = x.shape
    d = discrete_code_dim
    assert 0 < d < _OUT_LANES, "packed-output layout needs discrete_code_dim < 128"

    (w1, b1, w2, b2, wg, bg, wq1, bq1, wq2, bq2) = params

    # ---- wrapper-side repacking (layout plumbing, not compute hoisting) ----
    # Fuse the N=1 GAN head into the Q-head's first matmul (pad to 256 lanes).
    wh = jnp.zeros((_HIDDEN, 2 * _HIDDEN), jnp.float32)
    wh = wh.at[:, :_HIDDEN].set(wq1).at[:, _HIDDEN:_HIDDEN + 1].set(wg)
    bh = jnp.zeros((1, 2 * _HIDDEN), jnp.float32)
    bh = bh.at[:, :_HIDDEN].set(bq1).at[:, _HIDDEN:_HIDDEN + 1].set(bg)

    # Drop the unused continuous-code columns; pad to a lane-dense 128.
    wq = jnp.zeros((_HIDDEN, _OUT_LANES), jnp.float32).at[:, :d].set(wq2[:, :d])
    bq = jnp.zeros((1, _OUT_LANES), jnp.float32).at[:, :d].set(bq2[:, :d])

    # MXU operands in mxu_dtype (bf16 on v6e/v7x for HBM/MXU savings); biases f32.
    cast = lambda a: a.astype(mxu_dtype)
    inputs = (cast(x), cast(w1), b1, cast(w2), b2, cast(wh), bh, cast(wq), bq)

    tb = min(batch_tile, B)
    grid = (pl.cdiv(B, tb),)

    row_spec = lambda cols: pl.BlockSpec((tb, cols), lambda i: (i, 0))
    res_spec = lambda a: pl.BlockSpec(a.shape, lambda i: (0, 0))  # stays resident
    in_specs = [row_spec(data_dim)] + [res_spec(a) for a in inputs[1:]]

    flops = 2 * B * (data_dim * _HIDDEN + _HIDDEN * _HIDDEN
                     + _HIDDEN * 2 * _HIDDEN + _HIDDEN * _OUT_LANES)
    bytes_accessed = int(sum(a.size * a.dtype.itemsize for a in inputs)
                         + B * _OUT_LANES * 4)

    kernel = functools.partial(infogan_disc_kernel, slope=slope, d=d)

    packed = pl.pallas_call(
        kernel,
        out_shape=jax.ShapeDtypeStruct((B, _OUT_LANES), jnp.float32),
        grid=grid,
        in_specs=in_specs,
        out_specs=row_spec(_OUT_LANES),
        compiler_params=pltpu.CompilerParams(dimension_semantics=("parallel",)),
        cost_estimate=pl.CostEstimate(flops=flops, transcendentals=2 * B,
                                      bytes_accessed=bytes_accessed),
    )(*inputs)

    regular_gan_out = packed[:, d:d + 1]
    q_discrete = packed[:, :d]
    return regular_gan_out, q_discrete


def init_params(key, data_dim, discrete_code_dim, continuous_code_dim):
    """Deterministic synthetic parameters with the module's shapes.

    Weights are stored as [in, out] (PyTorch weight.T), biases as [1, out].
    """
    q_out_dim = discrete_code_dim + continuous_code_dim * 2
    shapes = [
        (data_dim, _HIDDEN), (1, _HIDDEN),      # discriminator linear 1
        (_HIDDEN, _HIDDEN), (1, _HIDDEN),       # discriminator linear 2
        (_HIDDEN, 1), (1, 1),                   # regular_gan
        (_HIDDEN, _HIDDEN), (1, _HIDDEN),       # infogan_q linear 1
        (_HIDDEN, q_out_dim), (1, q_out_dim),   # infogan_q linear 2
    ]
    keys = jax.random.split(key, len(shapes))
    return tuple(0.1 * jax.random.normal(k, s, dtype=jnp.float32)
                 for k, s in zip(keys, shapes))


def reference_forward(x, params, discrete_code_dim):
    (w1, b1, w2, b2, wg, bg, wq1, bq1, wq2, bq2) = params
    h = _leaky_relu(x @ w1 + b1, 0.1)
    h = h @ w2 + b2
    gan = jax.nn.sigmoid(h @ wg + bg)
    q = _leaky_relu(h @ wq1 + bq1, 0.1)
    q = q @ wq2 + bq2
    return gan, q[:, :discrete_code_dim]


if __name__ == "__main__":
    B = 512
    data_dim = 64
    discrete_code_dim = 10
    continuous_code_dim = 2

    key = jax.random.PRNGKey(0)
    kx, kp = jax.random.split(key)
    x = jax.random.normal(kx, (B, data_dim), dtype=jnp.float32)
    params = init_params(kp, data_dim, discrete_code_dim, continuous_code_dim)

    gan_ref, q_ref = reference_forward(x, params, discrete_code_dim)

    # f32 MXU path (default): tight check against the pure-JAX reference.
    gan, qd = infogan_discriminator(x, params, discrete_code_dim,
                                    batch_tile=256, mxu_dtype=jnp.float32)
    gan = jax.block_until_ready(gan)
    qd = jax.block_until_ready(qd)
    assert gan.shape == (B, 1)
    assert qd.shape == (B, discrete_code_dim)
    assert jnp.allclose(qd, q_ref, atol=1e-4, rtol=1e-4)
    # gan uses the approximate EUP reciprocal -> slightly looser tolerance
    assert jnp.allclose(gan, gan_ref, atol=5e-3, rtol=5e-3)

    # bf16 MXU-operand path (v6e/v7x recommendation): loose numerical check.
    gan_bf, qd_bf = infogan_discriminator(x, params, discrete_code_dim,
                                          batch_tile=256, mxu_dtype=jnp.bfloat16)
    gan_bf = jax.block_until_ready(gan_bf)
    qd_bf = jax.block_until_ready(qd_bf)
    assert jnp.allclose(qd_bf, q_ref, atol=5e-2, rtol=5e-2)
    assert jnp.allclose(gan_bf, gan_ref, atol=5e-2, rtol=5e-2)

    print("KERNEL_OK")
</pallas_src>

<mosaic_0001>
module attributes {stable_mosaic.version = 11 : i64} {
  func.func @infogan_disc_kernel(%arg0: i32, %arg1: memref<256x64xf32, #tpu.memory_space<vmem>>, %arg2: memref<64x128xf32, #tpu.memory_space<vmem>>, %arg3: memref<1x128xf32, #tpu.memory_space<vmem>>, %arg4: memref<128x128xf32, #tpu.memory_space<vmem>>, %arg5: memref<1x128xf32, #tpu.memory_space<vmem>>, %arg6: memref<128x256xf32, #tpu.memory_space<vmem>>, %arg7: memref<1x256xf32, #tpu.memory_space<vmem>>, %arg8: memref<128x128xf32, #tpu.memory_space<vmem>>, %arg9: memref<1x128xf32, #tpu.memory_space<vmem>>, %arg10: memref<256x128xf32, #tpu.memory_space<vmem>>) attributes {dimension_semantics = [#tpu.dimension_semantics<parallel>], iteration_bounds = array<i64: 2>, scalar_prefetch = 0 : i64, scratch_operands = 0 : i64, tpu.core_type = #tpu.core_type<tc>, window_params = [{transform_indices = @transform_0, window_bounds = array<i64: 256, 64>}, {pipeline_mode = #tpu.pipeline_mode<synchronous>, transform_indices = @transform_1, window_bounds = array<i64: 64, 128>}, {pipeline_mode = #tpu.pipeline_mode<synchronous>, transform_indices = @transform_2, window_bounds = array<i64: 1, 128>}, {pipeline_mode = #tpu.pipeline_mode<synchronous>, transform_indices = @transform_3, window_bounds = array<i64: 128, 128>}, {pipeline_mode = #tpu.pipeline_mode<synchronous>, transform_indices = @transform_4, window_bounds = array<i64: 1, 128>}, {pipeline_mode = #tpu.pipeline_mode<synchronous>, transform_indices = @transform_5, window_bounds = array<i64: 128, 256>}, {pipeline_mode = #tpu.pipeline_mode<synchronous>, transform_indices = @transform_6, window_bounds = array<i64: 1, 256>}, {pipeline_mode = #tpu.pipeline_mode<synchronous>, transform_indices = @transform_7, window_bounds = array<i64: 128, 128>}, {pipeline_mode = #tpu.pipeline_mode<synchronous>, transform_indices = @transform_8, window_bounds = array<i64: 1, 128>}, {transform_indices = @transform_9, window_bounds = array<i64: 256, 128>}]} {
    %c0 = arith.constant 0 : index
    %c0_0 = arith.constant 0 : index
    %0 = vector.load %arg1[%c0, %c0_0] : memref<256x64xf32, #tpu.memory_space<vmem>>, vector<256x64xf32>
    %c0_1 = arith.constant 0 : index
    %c0_2 = arith.constant 0 : index
    %1 = vector.load %arg2[%c0_1, %c0_2] : memref<64x128xf32, #tpu.memory_space<vmem>>, vector<64x128xf32>
    %cst = arith.constant dense<0.000000e+00> : vector<256x128xf32>
    %2 = tpu.matmul %0, %1, %cst {dimension_numbers = #tpu.dot_dimension_numbers<[1], [0], [0], [1], [0, 0, 1, 1], [], []>} : vector<256x64xf32>, vector<64x128xf32>, vector<256x128xf32> -> vector<256x128xf32>
    %c0_3 = arith.constant 0 : index
    %c0_4 = arith.constant 0 : index
    %3 = vector.load %arg3[%c0_3, %c0_4] : memref<1x128xf32, #tpu.memory_space<vmem>>, vector<1x128xf32>
    %4 = vector.broadcast %3 : vector<1x128xf32> to vector<256x128xf32>
    %5 = arith.addf %2, %4 : vector<256x128xf32>
    %cst_5 = arith.constant 0.000000e+00 : f32
    %6 = vector.broadcast %cst_5 : f32 to vector<256x128xf32>
    %7 = arith.cmpf ogt, %5, %6 : vector<256x128xf32>
    %cst_6 = arith.constant 1.000000e-01 : f32
    %8 = vector.broadcast %cst_6 : f32 to vector<256x128xf32>
    %9 = arith.mulf %8, %5 : vector<256x128xf32>
    %10 = arith.select %7, %5, %9 : vector<256x128xi1>, vector<256x128xf32>
    %c0_7 = arith.constant 0 : index
    %c0_8 = arith.constant 0 : index
    %11 = vector.load %arg4[%c0_7, %c0_8] : memref<128x128xf32, #tpu.memory_space<vmem>>, vector<128x128xf32>
    %cst_9 = arith.constant dense<0.000000e+00> : vector<256x128xf32>
    %12 = tpu.matmul %10, %11, %cst_9 {dimension_numbers = #tpu.dot_dimension_numbers<[1], [0], [0], [1], [0, 0, 1, 1], [], []>} : vector<256x128xf32>, vector<128x128xf32>, vector<256x128xf32> -> vector<256x128xf32>
    %c0_10 = arith.constant 0 : index
    %c0_11 = arith.constant 0 : index
    %13 = vector.load %arg5[%c0_10, %c0_11] : memref<1x128xf32, #tpu.memory_space<vmem>>, vector<1x128xf32>
    %14 = vector.broadcast %13 : vector<1x128xf32> to vector<256x128xf32>
    %15 = arith.addf %12, %14 : vector<256x128xf32>
    %c0_12 = arith.constant 0 : index
    %c0_13 = arith.constant 0 : index
    %16 = vector.load %arg6[%c0_12, %c0_13] : memref<128x256xf32, #tpu.memory_space<vmem>>, vector<128x256xf32>
    %cst_14 = arith.constant dense<0.000000e+00> : vector<256x256xf32>
    %17 = tpu.matmul %15, %16, %cst_14 {dimension_numbers = #tpu.dot_dimension_numbers<[1], [0], [0], [1], [0, 0, 1, 1], [], []>} : vector<256x128xf32>, vector<128x256xf32>, vector<256x256xf32> -> vector<256x256xf32>
    %c0_15 = arith.constant 0 : index
    %c0_16 = arith.constant 0 : index
    %18 = vector.load %arg7[%c0_15, %c0_16] : memref<1x256xf32, #tpu.memory_space<vmem>>, vector<1x256xf32>
    %19 = vector.broadcast %18 : vector<1x256xf32> to vector<256x256xf32>
    %20 = arith.addf %17, %19 : vector<256x256xf32>
    %21 = vector.extract_strided_slice %20 {offsets = [0, 0], sizes = [256, 128], strides = [1, 1]} : vector<256x256xf32> to vector<256x128xf32>
    %cst_17 = arith.constant 0.000000e+00 : f32
    %22 = vector.broadcast %cst_17 : f32 to vector<256x128xf32>
    %23 = arith.cmpf ogt, %21, %22 : vector<256x128xf32>
    %cst_18 = arith.constant 1.000000e-01 : f32
    %24 = vector.broadcast %cst_18 : f32 to vector<256x128xf32>
    %25 = arith.mulf %24, %21 : vector<256x128xf32>
    %26 = arith.select %23, %21, %25 : vector<256x128xi1>, vector<256x128xf32>
    %27 = vector.extract_strided_slice %20 {offsets = [0, 128], sizes = [256, 1], strides = [1, 1]} : vector<256x256xf32> to vector<256x1xf32>
    %c0_19 = arith.constant 0 : index
    %c0_20 = arith.constant 0 : index
    %28 = vector.load %arg8[%c0_19, %c0_20] : memref<128x128xf32, #tpu.memory_space<vmem>>, vector<128x128xf32>
    %cst_21 = arith.constant dense<0.000000e+00> : vector<256x128xf32>
    %29 = tpu.matmul %26, %28, %cst_21 {dimension_numbers = #tpu.dot_dimension_numbers<[1], [0], [0], [1], [0, 0, 1, 1], [], []>} : vector<256x128xf32>, vector<128x128xf32>, vector<256x128xf32> -> vector<256x128xf32>
    %c0_22 = arith.constant 0 : index
    %c0_23 = arith.constant 0 : index
    %30 = vector.load %arg9[%c0_22, %c0_23] : memref<1x128xf32, #tpu.memory_space<vmem>>, vector<1x128xf32>
    %31 = vector.broadcast %30 : vector<1x128xf32> to vector<256x128xf32>
    %32 = arith.addf %29, %31 : vector<256x128xf32>
    %cst_24 = arith.constant 0.000000e+00 : f32
    %33 = vector.broadcast %cst_24 : f32 to vector<256x1xf32>
    %34 = arith.subf %33, %27 : vector<256x1xf32>
    %35 = math.exp %34 : vector<256x1xf32>
    %cst_25 = arith.constant 1.000000e+00 : f32
    %36 = vector.broadcast %cst_25 : f32 to vector<256x1xf32>
    %37 = arith.addf %36, %35 : vector<256x1xf32>
    %38 = tpu.reciprocal %37 {approx = true} : vector<256x1xf32> -> vector<256x1xf32>
    %39 = tpu.iota {dimensions = array<i32: 1>} : vector<256x128xi32>
    %c10_i32 = arith.constant 10 : i32
    %40 = vector.broadcast %c10_i32 : i32 to vector<256x128xi32>
    %41 = arith.cmpi eq, %39, %40 : vector<256x128xi32>
    %42 = vector.shape_cast %38 : vector<256x1xf32> to vector<256x1xf32>
    %43 = vector.broadcast %42 : vector<256x1xf32> to vector<256x128xf32>
    %44 = arith.select %41, %43, %32 : vector<256x128xi1>, vector<256x128xf32>
    %c0_26 = arith.constant 0 : index
    %c0_27 = arith.constant 0 : index
    %45 = vector.load %arg10[%c0_26, %c0_27] : memref<256x128xf32, #tpu.memory_space<vmem>>, vector<256x128xf32>
    tpu.vector_store %arg10[%c0_26, %c0_27], %44 {strides = array<i32>} : memref<256x128xf32, #tpu.memory_space<vmem>>, vector<256x128xf32>,
    return
  }
  func.func @transform_0(%arg0: i32) -> (i32, i32) {
    %c0_i32 = arith.constant 0 : i32
    %c0_i32_0 = arith.constant 0 : i32
    return %arg0, %c0_i32 : i32, i32
  }
  func.func @transform_1(%arg0: i32) -> (i32, i32) {
    %c0_i32 = arith.constant 0 : i32
    %c0_i32_0 = arith.constant 0 : i32
    %c0_i32_1 = arith.constant 0 : i32
    return %c0_i32, %c0_i32_0 : i32, i32
  }
  func.func @transform_2(%arg0: i32) -> (i32, i32) {
    %c0_i32 = arith.constant 0 : i32
    %c0_i32_0 = arith.constant 0 : i32
    %c0_i32_1 = arith.constant 0 : i32
    return %c0_i32, %c0_i32_0 : i32, i32
  }
  func.func @transform_3(%arg0: i32) -> (i32, i32) {
    %c0_i32 = arith.constant 0 : i32
    %c0_i32_0 = arith.constant 0 : i32
    %c0_i32_1 = arith.constant 0 : i32
    return %c0_i32, %c0_i32_0 : i32, i32
  }
  func.func @transform_4(%arg0: i32) -> (i32, i32) {
    %c0_i32 = arith.constant 0 : i32
    %c0_i32_0 = arith.constant 0 : i32
    %c0_i32_1 = arith.constant 0 : i32
    return %c0_i32, %c0_i32_0 : i32, i32
  }
  func.func @transform_5(%arg0: i32) -> (i32, i32) {
    %c0_i32 = arith.constant 0 : i32
    %c0_i32_0 = arith.constant 0 : i32
    %c0_i32_1 = arith.constant 0 : i32
    return %c0_i32, %c0_i32_0 : i32, i32
  }
  func.func @transform_6(%arg0: i32) -> (i32, i32) {
    %c0_i32 = arith.constant 0 : i32
    %c0_i32_0 = arith.constant 0 : i32
    %c0_i32_1 = arith.constant 0 : i32
    return %c0_i32, %c0_i32_0 : i32, i32
  }
  func.func @transform_7(%arg0: i32) -> (i32, i32) {
    %c0_i32 = arith.constant 0 : i32
    %c0_i32_0 = arith.constant 0 : i32
    %c0_i32_1 = arith.constant 0 : i32
    return %c0_i32, %c0_i32_0 : i32, i32
  }
  func.func @transform_8(%arg0: i32) -> (i32, i32) {
    %c0_i32 = arith.constant 0 : i32
    %c0_i32_0 = arith.constant 0 : i32
    %c0_i32_1 = arith.constant 0 : i32
    return %c0_i32, %c0_i32_0 : i32, i32
  }
  func.func @transform_9(%arg0: i32) -> (i32, i32) {
    %c0_i32 = arith.constant 0 : i32
    %c0_i32_0 = arith.constant 0 : i32
    return %arg0, %c0_i32 : i32, i32
  }
}

</mosaic_0001>

<bundles_post_ra>
// kernel: tpu_custom_call.1
= control target key start
LH: loop header
LB: loop body
LE: loop exit
PB: predicated region body
PF: predicated region fallthrough
CT: control target
= control target key end

     0   :  { %14 = vsyncpa [#allocation3], 0  ;;  %s3583_s0 = inlined_call_operand.vmem [shape: f32[512,64], index: 0, kind: input, shape index: {}]   ;;  %s3584_s1 = inlined_call_operand.vmem [shape: f32[64,128], index: 1, kind: input, shape index: {}]   ;;  %s3585_s2 = inlined_call_operand.vmem [shape: f32[1,128], index: 2, kind: input, shape index: {}]   ;;  %s3586_s3 = inlined_call_operand.vmem [shape: f32[128,128], index: 3, kind: input, shape index: {}]   ;;  %s3587_s4 = inlined_call_operand.vmem [shape: f32[1,128], index: 4, kind: input, shape index: {}]   ;;  %s3588_s5 = inlined_call_operand.vmem [shape: f32[128,256], index: 5, kind: input, shape index: {}]   ;;  %s3589_s6 = inlined_call_operand.vmem [shape: f32[1,256], index: 6, kind: input, shape index: {}]   ;;  %s3590_s7 = inlined_call_operand.vmem [shape: f32[128,128], index: 7, kind: input, shape index: {}]   ;;  %s3591_s8 = inlined_call_operand.vmem [shape: f32[1,128], index: 8, kind: input, shape index: {}]   ;;  %s3592_s9 = inlined_call_operand.hbm [shape: f32[512,128], index: 9, kind: output, shape index: {}]  }
   0x1   :  { %16 = vsyncpa [#allocation3 + $0x1], 0  ;;  %s2869_s30 = smov 0   ;;  %s2871_s10 = smov 0  }
   0x2   :  { %s2873_s11 = smov 0   ;;  %s2875_s12 = smov 0  }
   0x3 LB: > { %s2890_s13 = sadd.s32 4294967295, %s2812_s12   ;;  %s2155_s14 = sadd.s32 4294967294, %s2812_s12   ;;  %s2812_s12 = sphi %s2875_s12, %s3598_s12   ;;  %s2808_s11 = sphi %s2873_s11, %s3597_s11   ;;  %s2804_s10 = sphi %s2871_s10, %s3596_s10   ;;  %s2800_s30 = sphi %s2869_s30, %s3595_s30  }
   0x4   : > { %s2894_s15 = sadd.s32 1, %s2812_s12   ;;  %s223_s16 = sadd.s32 1, %s2808_s11 }
   0x5   : > { %s220_s17 = ssub.s32 %s2812_s12, %s2894_s15  ;;  %p233_p0 = scmp.ne.s32.totalorder %s2808_s11, %s2804_s10 }
   0x6   : > { %p221_p1 = scmp.eq.s32.totalorder %s220_s17, 0  ;;  %p234_p2 = scmp.eq.s32.totalorder %s2890_s13, 1 }
   0x7   : > { %p239_p3 = scmp.ne.s32.totalorder %s2804_s10, %s2800_s30  ;;  %p240_p4 = scmp.eq.s32.totalorder %s2155_s14, 1 }
   0x8   : > { %s2905_s18 = scalar_select %p221_p1, %s2808_s11, %s223_s16  }
   0x9   : > { %p2907_p5 = por %p234_p2, %p233_p0  ;;  %p2911_p6 = por %p240_p4, %p239_p3 }
   0xa   : > { %p2158_p7 = scmp.ge.s32.totalorder %s2812_s12, 1  ;;  %p291_p8 = scmp.lt.s32.totalorder %s2812_s12, 3 }
   0xc   : > { %p292_p9 = pnand %p2158_p7, %p291_p8 }
   0xd   : > { %s2160_s25 = sshll.u32 (!%p292_p9), %s2890_s13, 5  ;;  %s324_s22 = sand.u32 (!%p292_p9), 1, %s2804_s10  }
   0xe   : > { %295 = sbr.rel (%p292_p9) target bundleno = 968 (0x3c8), region = 56  ;;  %p328_p10 = scmp.lt.s32.totalorder (!%p292_p9), %s2160_s25, 63 }
   0xf   : > { %s2159_s24 = sshll.u32 (!%p292_p9), %s324_s22, 8  ;;  %s2202_s27 = sshll.u32 (!%p292_p9), %s2890_s13, 12 }
  0x10   : > { %s3533_s16 = scalar_lea.hbm (!%p292_p9), %s3592_s9, %s2202_s27  ;;  %s3543_s13 = scalar_lea.sflag (!%p292_p9), [#allocation3], %s324_s22 }
  0x11   : > { %s2816_s21 = smov (!%p292_p9), [#allocation2]  }
  0x13   : > { %v373_v0 = vld [vmem:[%s3584_s1 + $0x38] sm:$0xff]  ;;  %v372_v1 = vld [vmem:[%s3584_s1 + $0x30] sm:$0xff]  ;;  %v371_v2 = vld [vmem:[%s3584_s1 + $0x28] sm:$0xff]  ;;  %s3600_s25 = smov (!%p328_p10, %s2160_s25), 63  ;;  %vm381_vm0 = vcmask 523264  }
  0x14   : > { %2339 = vmatprep.subr.mxu0 %v373_v0  ;;  %2563 = vmatprep.subr.mxu1 %v373_v0  ;;  %v370_v3 = vld [vmem:[%s3584_s1 + $0x20] sm:$0xff]  ;;  %s2161_s14 = sshll.u32 %s3600_s25, 3  ;;  %v369_v4 = vld [vmem:[%s3584_s1 + $0x18] sm:$0xff]  ;;  %v368_v6 = vld [vmem:[%s3584_s1 + $0x10] sm:$0xff] }
  0x15   : > { %2340 = vmatpush3.msra.mxu0 %v373_v0  ;;  %2571 = vmatpush3.msra.mxu1 %v373_v0  ;;  %s2936_s23 = scalar_lea.vmem %s3583_s0, %s2161_s14  ;;  %v367_v7 = vld [vmem:[%s3584_s1 + $0x8] sm:$0xff]  ;;  %v366_v8 = vld [vmem:[%s3584_s1] sm:$0xff]  ;;  %v814_v13 = vld [vmem:[%s3586_s3 + $0x78] sm:$0xff] }
  0x16   : > { %2341 = vmatprep.subr.mxu0 %v372_v1  ;;  %2564 = vmatprep.subr.mxu1 %v372_v1  ;;  %v334_v5 = vld [vmem:[%s2936_s23] sm:$0xff]  ;;  %v335_v9 = vld [vmem:[%s2936_s23 + $0x8] sm:$0xff]  ;;  %v336_v10 = vld [vmem:[%s2936_s23 + $0x10] sm:$0xff] }
  0x17   : > { %2342 = vmatpush3.msra.mxu0 %v372_v1  ;;  %2572 = vmatpush3.msra.mxu1 %v372_v1  ;;  %v350_v11 = vld [vmem:[%s2936_s23 + $0x80] sm:$0xff]  ;;  %v351_v12 = vld [vmem:[%s2936_s23 + $0x88] sm:$0xff]  ;;  %v352_v14 = vld [vmem:[%s2936_s23 + $0x90] sm:$0xff] }
  0x18   : > { %2343 = vmatprep.subr.mxu0 %v371_v2  ;;  %2565 = vmatprep.subr.mxu1 %v371_v2  ;;  %v337_v15 = vld [vmem:[%s2936_s23 + $0x18] sm:$0xff]  ;;  %v813_v16 = vld [vmem:[%s3586_s3 + $0x70] sm:$0xff]  ;;  %v338_v17 = vld [vmem:[%s2936_s23 + $0x20] sm:$0xff] }
  0x19   : > { %2344 = vmatpush3.msra.mxu0 %v371_v2  ;;  %2573 = vmatpush3.msra.mxu1 %v371_v2  ;;  %v353_v18 = vld [vmem:[%s2936_s23 + $0x98] sm:$0xff]  ;;  %v812_v19 = vld [vmem:[%s3586_s3 + $0x68] sm:$0xff]  ;;  %v354_v20 = vld [vmem:[%s2936_s23 + $0xa0] sm:$0xff] }
  0x1a   : > { %2345 = vmatprep.subr.mxu0 %v370_v3  ;;  %2566 = vmatprep.subr.mxu1 %v370_v3  ;;  %v339_v21 = vld [vmem:[%s2936_s23 + $0x28] sm:$0xff]  ;;  %v811_v22 = vld [vmem:[%s3586_s3 + $0x60] sm:$0xff]  ;;  %v340_v23 = vld [vmem:[%s2936_s23 + $0x30] sm:$0xff] }
  0x1b   : > { %2346 = vmatpush3.msra.mxu0 %v370_v3  ;;  %2355 = vmatprep.mubr.msk.f32.mxu0 %vm381_vm0, %v334_v5  ;;  %v355_v24 = vld [vmem:[%s2936_s23 + $0xa8] sm:$0xff]  ;;  %v810_v25 = vld [vmem:[%s3586_s3 + $0x58] sm:$0xff]  ;;  %v356_v26 = vld [vmem:[%s2936_s23 + $0xb0] sm:$0xff] }
  0x1c   : > { %2347 = vmatprep.subr.mxu0 %v369_v4  ;;  %2574 = vmatpush3.msra.mxu1 %v370_v3  ;;  %v341_v27 = vld [vmem:[%s2936_s23 + $0x38] sm:$0xff]  ;;  %v809_v28 = vld [vmem:[%s3586_s3 + $0x50] sm:$0xff]  ;;  %v342_v29 = vld [vmem:[%s2936_s23 + $0x40] sm:$0xff] }
  0x1d   : > { %2348 = vmatpush3.msra.mxu0 %v369_v4  ;;  %2567 = vmatprep.subr.mxu1 %v369_v4  ;;  %v357_v30 = vld [vmem:[%s2936_s23 + $0xb8] sm:$0xff]  ;;  %v808_v31 = vld [vmem:[%s3586_s3 + $0x48] sm:$0xff]  ;;  %v358_v32 = vld [vmem:[%s2936_s23 + $0xc0] sm:$0xff] }
  0x1e   : > { %2349 = vmatprep.subr.mxu0 %v368_v6  ;;  %2575 = vmatpush3.msra.mxu1 %v369_v4  ;;  %v343_v33 = vld [vmem:[%s2936_s23 + $0x48] sm:$0xff]  ;;  %v807_v34 = vld [vmem:[%s3586_s3 + $0x40] sm:$0xff]  ;;  %v344_v35 = vld [vmem:[%s2936_s23 + $0x50] sm:$0xff] }
  0x1f   : > { %2350 = vmatpush3.msra.mxu0 %v368_v6  ;;  %2568 = vmatprep.subr.mxu1 %v368_v6  ;;  %v359_v36 = vld [vmem:[%s2936_s23 + $0xc8] sm:$0xff]  ;;  %v806_v37 = vld [vmem:[%s3586_s3 + $0x38] sm:$0xff]  ;;  %v360_v38 = vld [vmem:[%s2936_s23 + $0xd0] sm:$0xff] }
  0x20   : > { %2351 = vmatprep.subr.mxu0 %v367_v7  ;;  %2576 = vmatpush3.msra.mxu1 %v368_v6  ;;  %v345_v39 = vld [vmem:[%s2936_s23 + $0x58] sm:$0xff]  ;;  %v805_v40 = vld [vmem:[%s3586_s3 + $0x30] sm:$0xff]  ;;  %v346_v41 = vld [vmem:[%s2936_s23 + $0x60] sm:$0xff] }
  0x21   : > { %2352 = vmatpush3.msra.mxu0 %v367_v7  ;;  %2569 = vmatprep.subr.mxu1 %v367_v7  ;;  %v361_v42 = vld [vmem:[%s2936_s23 + $0xd8] sm:$0xff]  ;;  %v804_v43 = vld [vmem:[%s3586_s3 + $0x28] sm:$0xff]  ;;  %v362_v44 = vld [vmem:[%s2936_s23 + $0xe0] sm:$0xff] }
  0x22   : > { %2353 = vmatprep.subr.mxu0 %v366_v8  ;;  %2577 = vmatpush3.msra.mxu1 %v367_v7  ;;  %v347_v45 = vld [vmem:[%s2936_s23 + $0x68] sm:$0xff]  ;;  %v803_v46 = vld [vmem:[%s3586_s3 + $0x20] sm:$0xff]  ;;  %v348_v47 = vld [vmem:[%s2936_s23 + $0x70] sm:$0xff] }
  0x23   : > { %2354 = vmatpush3.msra.mxu0 %v366_v8  ;;  %2570 = vmatprep.subr.mxu1 %v366_v8  ;;  %v363_v48 = vld [vmem:[%s2936_s23 + $0xe8] sm:$0xff]  ;;  %v364_v49 = vld [vmem:[%s2936_s23 + $0xf0] sm:$0xff]  ;;  %v349_v50 = vld [vmem:[%s2936_s23 + $0x78] sm:$0xff] }
  0x24   : > { %2356 = vmatmul.mubr.msk.f32.vlgmr.msra.gmra.mxu0 %vm381_vm0, %v335_v9  ;;  %2578 = vmatpush3.msra.mxu1 %v366_v8  ;;  %v365_v51 = vld [vmem:[%s2936_s23 + $0xf8] sm:$0xff]  ;;  %v801_v53 = vld [vmem:[%s3586_s3 + $0x10] sm:$0xff]  ;;  %v800_v54 = vld [vmem:[%s3586_s3 + $0x8] sm:$0xff]  ;;  %s3406_s23 = scalar_lea.vmem [#allocation2], %s2159_s24  ;;  %s2756_s24 = sshll.u32 %s2816_s21, 4  ;;  %s2757_s24 = int_to_ptr.vmem [resolvable:$false] %s2756_s24 }
  0x25   : > { %2358 = vmatprep.mubr.msk.f32.mxu0 %vm381_vm0, %v336_v10  ;;  %2379 = vmatprep.mubr.msk.f32.mxu1 %vm381_vm0, %v350_v11  ;;  %v802_v52 = vld [vmem:[%s3586_s3 + $0x18] sm:$0xff]  ;;  %v799_v55 = vld [vmem:[%s3586_s3] sm:$0xff]  ;;  %v1077_v57 = vld [vmem:[%s3588_s5 + $0xf0] sm:$0xff]  ;;  %s2093_s28 = sshll.u32 %s3406_s23, 4  ;;  %s2758_s25 = scalar_lea.vmem %s2757_s24, 8192  ;;  %s3535_s28 = int_to_ptr.vmem [resolvable:$true] %s2093_s28 }
  0x26   : > { %2380 = vmatmul.mubr.msk.f32.vlgmr.msra.gmra.mxu1 %vm381_vm0, %v351_v12  ;;  %2403 = vmatprep.subr.mxu1 %v814_v13  ;;  %v1078_v56 = vld [vmem:[%s3588_s5 + $0xf8] sm:$0xff]  ;;  %v1076_v58 = vld [vmem:[%s3588_s5 + $0xe8] sm:$0xff]  ;;  %v1075_v59 = vld [vmem:[%s3588_s5 + $0xe0] sm:$0xff]  ;;  %s2752_s17 = scalar_lea.vmem %s3535_s28, 4096  ;;  %p2759_p0 = scmp.lt.s32.totalorder %s3535_s28, %s2757_s24 }
  0x27   : > { %2382 = vmatprep.mubr.msk.f32.mxu1 %vm381_vm0, %v352_v14  ;;  %2404 = vmatpush3.msra.mxu1 %v814_v13  ;;  %v1074_v60 = vld [vmem:[%s3588_s5 + $0xd8] sm:$0xff]  ;;  %v1073_v61 = vld [vmem:[%s3588_s5 + $0xd0] sm:$0xff]  ;;  %v1072_v62 = vld [vmem:[%s3588_s5 + $0xc8] sm:$0xff]  ;;  %p2753_p11 = scmp.ne.s32.totalorder %s3535_s28, %s2752_s17  ;;  %p2760_p1 = scmp.lt.s32.totalorder %s2758_s25, %s2752_s17 }
  0x28   : > { %2359 = vmatmul.mubr.msk.f32.gmra.mxu0 %vm381_vm0, %v337_v15  ;;  %2405 = vmatprep.subr.mxu1 %v813_v16  ;;  %v1071_v63 = vld [vmem:[%s3588_s5 + $0xc0] sm:$0xff]  ;;  %v1070_v0 = vld [vmem:[%s3588_s5 + $0xb8] sm:$0xff]  ;;  %v1069_v1 = vld [vmem:[%s3588_s5 + $0xb0] sm:$0xff] }
  0x29   : > { %2361 = vmatprep.mubr.msk.f32.mxu0 %vm381_vm0, %v338_v17  ;;  %2406 = vmatpush3.msra.mxu1 %v813_v16  ;;  %v1068_v2 = vld [vmem:[%s3588_s5 + $0xa8] sm:$0xff]  ;;  %v1067_v3 = vld [vmem:[%s3588_s5 + $0xa0] sm:$0xff]  ;;  %v1066_v4 = vld [vmem:[%s3588_s5 + $0x98] sm:$0xff]  ;;  %p2754_p12 = pnand %p2753_p11, %p2907_p5  ;;  %p2761_p2 = por %p2760_p1, %p2759_p0 }
  0x2a   : > { %2383 = vmatmul.mubr.msk.f32.gmra.mxu1 %vm381_vm0, %v353_v18  ;;  %2407 = vmatprep.subr.mxu1 %v812_v19  ;;  %v1065_v5 = vld [vmem:[%s3588_s5 + $0x90] sm:$0xff]  ;;  %v1064_v6 = vld [vmem:[%s3588_s5 + $0x88] sm:$0xff]  ;;  %v1063_v7 = vld [vmem:[%s3588_s5 + $0x80] sm:$0xff] }
  0x2b   : > { %2385 = vmatprep.mubr.msk.f32.mxu1 %vm381_vm0, %v354_v20  ;;  %2408 = vmatpush3.msra.mxu1 %v812_v19  ;;  %v1062_v8 = vld [vmem:[%s3588_s5 + $0x78] sm:$0xff]  ;;  %v1061_v9 = vld [vmem:[%s3588_s5 + $0x70] sm:$0xff]  ;;  %v1060_v10 = vld [vmem:[%s3588_s5 + $0x68] sm:$0xff]  ;;  %p2755_p13 = pneg %p2754_p12 }
  0x2c   : > { %2362 = vmatmul.mubr.msk.f32.gmra.mxu0 %vm381_vm0, %v339_v21  ;;  %2409 = vmatprep.subr.mxu1 %v811_v22  ;;  %v1059_v11 = vld [vmem:[%s3588_s5 + $0x60] sm:$0xff]  ;;  %v1058_v12 = vld [vmem:[%s3588_s5 + $0x58] sm:$0xff]  ;;  %v1057_v13 = vld [vmem:[%s3588_s5 + $0x50] sm:$0xff] }
  0x2d   : > { %2364 = vmatprep.mubr.msk.f32.mxu0 %vm381_vm0, %v340_v23  ;;  %2410 = vmatpush3.msra.mxu1 %v811_v22  ;;  %v1056_v14 = vld [vmem:[%s3588_s5 + $0x48] sm:$0xff]  ;;  %v1055_v15 = vld [vmem:[%s3588_s5 + $0x40] sm:$0xff]  ;;  %v1054_v16 = vld [vmem:[%s3588_s5 + $0x38] sm:$0xff]  ;;  %p2762_p3 = pnand %p2761_p2, %p2755_p13 }
  0x2e   : > { %2386 = vmatmul.mubr.msk.f32.gmra.mxu1 %vm381_vm0, %v355_v24  ;;  %2411 = vmatprep.subr.mxu1 %v810_v25  ;;  %v1053_v17 = vld [vmem:[%s3588_s5 + $0x30] sm:$0xff]  ;;  %v1052_v18 = vld [vmem:[%s3588_s5 + $0x28] sm:$0xff]  ;;  %v1051_v19 = vld [vmem:[%s3588_s5 + $0x20] sm:$0xff] }
  0x2f   : > { %2388 = vmatprep.mubr.msk.f32.mxu1 %vm381_vm0, %v356_v26  ;;  %2412 = vmatpush3.msra.mxu1 %v810_v25  ;;  %v3146_v20 = vld [vmem:[%s3585_s2] ss:$0 sm:$0xff] }
  0x30   : > { %2365 = vmatmul.mubr.msk.f32.gmra.mxu0 %vm381_vm0, %v341_v27  ;;  %2413 = vmatprep.subr.mxu1 %v809_v28 }
  0x31   : > { %2367 = vmatprep.mubr.msk.f32.mxu0 %vm381_vm0, %v342_v29  ;;  %2414 = vmatpush3.msra.mxu1 %v809_v28 }
  0x32   : > { %2389 = vmatmul.mubr.msk.f32.gmra.mxu1 %vm381_vm0, %v357_v30  ;;  %2415 = vmatprep.subr.mxu1 %v808_v31 }
  0x33   : > { %2391 = vmatprep.mubr.msk.f32.mxu1 %vm381_vm0, %v358_v32  ;;  %2416 = vmatpush3.msra.mxu1 %v808_v31 }
  0x34   : > { %2368 = vmatmul.mubr.msk.f32.gmra.mxu0 %vm381_vm0, %v343_v33  ;;  %2417 = vmatprep.subr.mxu1 %v807_v34 }
  0x35   : > { %2370 = vmatprep.mubr.msk.f32.mxu0 %vm381_vm0, %v344_v35  ;;  %2418 = vmatpush3.msra.mxu1 %v807_v34 }
  0x36   : > { %2392 = vmatmul.mubr.msk.f32.gmra.mxu1 %vm381_vm0, %v359_v36  ;;  %2419 = vmatprep.subr.mxu1 %v806_v37 }
  0x37   : > { %2394 = vmatprep.mubr.msk.f32.mxu1 %vm381_vm0, %v360_v38  ;;  %2420 = vmatpush3.msra.mxu1 %v806_v37 }
  0x38   : > { %2371 = vmatmul.mubr.msk.f32.gmra.mxu0 %vm381_vm0, %v345_v39  ;;  %2421 = vmatprep.subr.mxu1 %v805_v40 }
  0x39   : > { %2373 = vmatprep.mubr.msk.f32.mxu0 %vm381_vm0, %v346_v41  ;;  %2422 = vmatpush3.msra.mxu1 %v805_v40 }
  0x3a   : > { %2395 = vmatmul.mubr.msk.f32.gmra.mxu1 %vm381_vm0, %v361_v42  ;;  %2423 = vmatprep.subr.mxu1 %v804_v43 }
  0x3b   : > { %2397 = vmatprep.mubr.msk.f32.mxu1 %vm381_vm0, %v362_v44  ;;  %2424 = vmatpush3.msra.mxu1 %v804_v43 }
  0x3c   : > { %2374 = vmatmul.mubr.msk.f32.gmra.mxu0 %vm381_vm0, %v347_v45  ;;  %2425 = vmatprep.subr.mxu1 %v803_v46 }
  0x3d   : > { %2376 = vmatprep.mubr.msk.f32.mxu0 %vm381_vm0, %v348_v47  ;;  %2426 = vmatpush3.msra.mxu1 %v803_v46 }
  0x3e   : > { %2398 = vmatmul.mubr.msk.f32.gmra.mxu1 %vm381_vm0, %v363_v48  ;;  %2427 = vmatprep.subr.mxu1 %v802_v52 }
  0x3f   : > { %2400 = vmatprep.mubr.msk.f32.mxu1 %vm381_vm0, %v364_v49  ;;  %2428 = vmatpush3.msra.mxu1 %v802_v52 }
  0x40   : > { %2377 = vmatmul.mubr.msk.f32.gmra.mxu0 %vm381_vm0, %v349_v50  ;;  %2429 = vmatprep.subr.mxu1 %v801_v53 }
  0x41   : > { %2430 = vmatpush3.msra.mxu1 %v801_v53  ;;  %1091 = vmatprep.subr.mxu0 %v1078_v56 }
  0x42   : > { %2401 = vmatmul.mubr.msk.f32.gmra.mxu1 %vm381_vm0, %v365_v51  ;;  %2431 = vmatprep.subr.mxu1 %v800_v54 }
  0x43   : > { %2432 = vmatpush3.msra.mxu1 %v800_v54  ;;  %1092 = vmatpush1.msra.mxu0 %v1077_v57 }
  0x44   : > { %2433 = vmatprep.subr.mxu1 %v799_v55  ;;  %1093 = vmatprep.subr.mxu0 %v1076_v58 }
  0x45   : > { %2434 = vmatpush3.msra.mxu1 %v799_v55  ;;  %1094 = vmatpush1.msra.mxu0 %v1075_v59 }
  0x46   : > { %1095 = vmatprep.subr.mxu0 %v1074_v60 }
  0x47   : > { %1096 = vmatpush1.msra.mxu0 %v1073_v61 }
  0x48   : > { %1097 = vmatprep.subr.mxu0 %v1072_v62 }
  0x49   : > { %1098 = vmatpush1.msra.mxu0 %v1071_v63 }
  0x4a   : > { %1099 = vmatprep.subr.mxu0 %v1070_v0 }
  0x4b   : > { %1100 = vmatpush1.msra.mxu0 %v1069_v1 }
  0x4c   : > { %1101 = vmatprep.subr.mxu0 %v1068_v2 }
  0x4d   : > { %1102 = vmatpush1.msra.mxu0 %v1067_v3 }
  0x4e   : > { %1103 = vmatprep.subr.mxu0 %v1066_v4 }
  0x4f   : > { %1104 = vmatpush1.msra.mxu0 %v1065_v5 }
  0x50   : > { %1105 = vmatprep.subr.mxu0 %v1064_v6 }
  0x51   : > { %1106 = vmatpush1.msra.mxu0 %v1063_v7 }
  0x52   : > { %1107 = vmatprep.subr.mxu0 %v1062_v8 }
  0x53   : > { %1108 = vmatpush1.msra.mxu0 %v1061_v9 }
  0x54   : > { %1109 = vmatprep.subr.mxu0 %v1060_v10 }
  0x55   : > { %1110 = vmatpush1.msra.mxu0 %v1059_v11 }
  0x56   : > { %1111 = vmatprep.subr.mxu0 %v1058_v12 }
  0x57   : > { %1112 = vmatpush1.msra.mxu0 %v1057_v13 }
  0x58   : > { %1113 = vmatprep.subr.mxu0 %v1056_v14 }
  0x59   : > { %1114 = vmatpush1.msra.mxu0 %v1055_v15 }
  0x5a   : > { %1115 = vmatprep.subr.mxu0 %v1054_v16 }
  0x5b   : > { %1116 = vmatpush1.msra.mxu0 %v1053_v17 }
  0x5c   : > { %1117 = vmatprep.subr.mxu0 %v1052_v18 }
  0x5d   : > { %1118 = vmatpush1.msra.mxu0 %v1051_v19 }
  0xe4   : > { %v2357_v21 = vpop.f32.mrf.mxu0 }
  0xe5   : > { %v550_v22 = vadd.f32 %v2357_v21, %v3146_v20 }
  0xe6   : > { %v544_v23 = vpop.f32.mrf.mxu0  ;;  %v3151_v30 = vpop.f32.mrf.mxu1 }
  0xe7   : > { %v545_v24 = vadd.f32 %v3146_v20, %v544_v23  ;;  %v736_v25 = vmul.f32 0.1, %v550_v22  ;;  %vm704_vm1 = vcmp.gt.f32.partialorder %v550_v22, 0.0 }
  0xe8   : > { %v2360_v26 = vpop.f32.mrf.mxu0  ;;  %v624_v40 = vpop.f32.mrf.mxu1 }
  0xe9   : > { %v735_v27 = vmul.f32 0.1, %v545_v24  ;;  %v560_v28 = vadd.f32 %v2360_v26, %v3146_v20  ;;  %vm703_vm2 = vcmp.gt.f32.partialorder %v545_v24, 0.0  ;;  %v768_v34 = vsel %vm704_vm1, %v550_v22, %v736_v25 }
  0xea   : > { %v554_v29 = vpop.f32.mrf.mxu0  ;;  %v3156_v45 = vpop.f32.mrf.mxu1  ;;  %v625_v14 = vadd.f32 %v3146_v20, %v624_v40  ;;  %v630_v25 = vadd.f32 %v3151_v30, %v3146_v20 }
  0xeb   : > { %v738_v31 = vmul.f32 0.1, %v560_v28  ;;  %v555_v32 = vadd.f32 %v3146_v20, %v554_v29  ;;  %v767_v33 = vsel %vm703_vm2, %v545_v24, %v735_v27  ;;  %vm706_vm3 = vcmp.gt.f32.partialorder %v560_v28, 0.0 }
  0xec   : > { %2435 = vmatprep.mubr.f32.mxu1 %v767_v33  ;;  %v2363_v35 = vpop.f32.mrf.mxu0  ;;  %v634_v54 = vpop.f32.mrf.mxu1  ;;  %v751_v26 = vmul.f32 0.1, %v625_v14  ;;  %vm719_vm0 = vcmp.gt.f32.partialorder %v625_v14, 0.0  ;;  %vm720_vm2 = vcmp.gt.f32.partialorder %v630_v25, 0.0 }
  0xed   : > { %v737_v36 = vmul.f32 0.1, %v555_v32  ;;  %v570_v37 = vadd.f32 %v2363_v35, %v3146_v20  ;;  %2436 = vmatmul.mubr.f32.vlgmr.msra.gmra.mxu1 %v768_v34  ;;  %vm705_vm4 = vcmp.gt.f32.partialorder %v555_v32, 0.0  ;;  %v770_v39 = vsel %vm706_vm3, %v560_v28, %v738_v31 }
  0xee   : > { %v564_v38 = vpop.f32.mrf.mxu0  ;;  %v3161_v59 = vpop.f32.mrf.mxu1  ;;  %v635_v27 = vadd.f32 %v3146_v20, %v634_v54  ;;  %v752_v34 = vmul.f32 0.1, %v630_v25 }
  0xef   : > { %v740_v41 = vmul.f32 0.1, %v570_v37  ;;  %v565_v42 = vadd.f32 %v3146_v20, %v564_v38  ;;  %v769_v43 = vsel %vm705_vm4, %v555_v32, %v737_v36  ;;  %vm708_vm5 = vcmp.gt.f32.partialorder %v570_v37, 0.0 }
  0xf0   : > { %2438 = vmatprep.mubr.f32.mxu1 %v769_v43  ;;  %v2366_v44 = vpop.f32.mrf.mxu0  ;;  %v644_v4 = vpop.f32.mrf.mxu1  ;;  %v640_v36 = vadd.f32 %v3156_v45, %v3146_v20  ;;  %v783_v38 = vsel %vm719_vm0, %v625_v14, %v751_v26  ;;  %vm721_vm3 = vcmp.gt.f32.partialorder %v635_v27, 0.0  ;;  %v784_v43 = vsel %vm720_vm2, %v630_v25, %v752_v34  ;;  %v1047_v25 = vld [vmem:[%s3588_s5] sm:$0xff]  ;;  %v1457_v34 = vld [vmem:[%s3590_s7 + $0x68] sm:$0xff] }
  0xf1   : > { %v739_v46 = vmul.f32 0.1, %v565_v42  ;;  %2439 = vmatmul.mubr.f32.gmra.mxu1 %v770_v39  ;;  %v580_v47 = vadd.f32 %v2366_v44, %v3146_v20  ;;  %vm707_vm6 = vcmp.gt.f32.partialorder %v565_v42, 0.0  ;;  %v772_v48 = vsel %vm708_vm5, %v570_v37, %v740_v41 }
  0xf2   : > { %v574_v49 = vpop.f32.mrf.mxu0  ;;  %v2390_v9 = vpop.f32.mrf.mxu1  ;;  %v753_v39 = vmul.f32 0.1, %v635_v27  ;;  %v645_v40 = vadd.f32 %v3146_v20, %v644_v4  ;;  %v650_v44 = vadd.f32 %v3161_v59, %v3146_v20  ;;  %vm722_vm4 = vcmp.gt.f32.partialorder %v640_v36, 0.0 }
  0xf3   : > { %v742_v50 = vmul.f32 0.1, %v580_v47  ;;  %v771_v51 = vsel %vm707_vm6, %v565_v42, %v739_v46  ;;  %v575_v52 = vadd.f32 %v3146_v20, %v574_v49  ;;  %vm710_vm7 = vcmp.gt.f32.partialorder %v580_v47, 0.0 }
  0xf4   : > { %2441 = vmatprep.mubr.f32.mxu1 %v771_v51  ;;  %v2369_v53 = vpop.f32.mrf.mxu0  ;;  %v654_v19 = vpop.f32.mrf.mxu1  ;;  %v754_v42 = vmul.f32 0.1, %v640_v36  ;;  %v785_v46 = vsel %vm721_vm3, %v635_v27, %v753_v39  ;;  %v755_v45 = vmul.f32 0.1, %v645_v40  ;;  %vm723_vm5 = vcmp.gt.f32.partialorder %v645_v40, 0.0  ;;  %v1454_v39 = vld [vmem:[%s3590_s7 + $0x50] sm:$0xff] }
  0xf5   : > { %2442 = vmatmul.mubr.f32.gmra.mxu1 %v772_v48  ;;  %v741_v55 = vmul.f32 0.1, %v575_v52  ;;  %v590_v56 = vadd.f32 %v2369_v53, %v3146_v20  ;;  %vm709_vm8 = vcmp.gt.f32.partialorder %v575_v52, 0.0  ;;  %v774_v57 = vsel %vm710_vm7, %v580_v47, %v742_v50 }
  0xf6   : > { %v584_v58 = vpop.f32.mrf.mxu0  ;;  %v2393_v28 = vpop.f32.mrf.mxu1  ;;  %v655_v47 = vadd.f32 %v3146_v20, %v654_v19  ;;  %v756_v49 = vmul.f32 0.1, %v650_v44  ;;  %v786_v50 = vsel %vm722_vm4, %v640_v36, %v754_v42  ;;  %v660_v51 = vadd.f32 %v2390_v9, %v3146_v20  ;;  %v1456_v36 = vld [vmem:[%s3590_s7 + $0x60] sm:$0xff] }
  0xf7   : > { %v744_v60 = vmul.f32 0.1, %v590_v56  ;;  %v773_v61 = vsel %vm709_vm8, %v575_v52, %v741_v55  ;;  %v585_v62 = vadd.f32 %v3146_v20, %v584_v58  ;;  %vm712_vm9 = vcmp.gt.f32.partialorder %v590_v56, 0.0 }
  0xf8   : > { %2444 = vmatprep.mubr.f32.mxu1 %v773_v61  ;;  %v2372_v63 = vpop.f32.mrf.mxu0  ;;  %v664_v30 = vpop.f32.mrf.mxu1  ;;  %v787_v53 = vsel %vm723_vm5, %v645_v40, %v755_v45  ;;  %vm724_vm6 = vcmp.gt.f32.partialorder %v650_v44, 0.0  ;;  %v757_v54 = vmul.f32 0.1, %v655_v47  ;;  %vm725_vm7 = vcmp.gt.f32.partialorder %v655_v47, 0.0 }
  0xf9   : > { %2445 = vmatmul.mubr.f32.gmra.mxu1 %v774_v57  ;;  %v743_v0 = vmul.f32 0.1, %v585_v62  ;;  %v600_v1 = vadd.f32 %v2372_v63, %v3146_v20  ;;  %vm711_vm10 = vcmp.gt.f32.partialorder %v585_v62, 0.0  ;;  %v776_v2 = vsel %vm712_vm9, %v590_v56, %v744_v60 }
  0xfa   : > { %v594_v3 = vpop.f32.mrf.mxu0  ;;  %v2396_v41 = vpop.f32.mrf.mxu1  ;;  %v665_v55 = vadd.f32 %v3146_v20, %v664_v30  ;;  %v758_v56 = vmul.f32 0.1, %v660_v51  ;;  %v788_v57 = vsel %vm724_vm6, %v650_v44, %v756_v49  ;;  %v670_v58 = vadd.f32 %v2393_v28, %v3146_v20  ;;  %v1459_v28 = vld [vmem:[%s3590_s7 + $0x78] sm:$0xff]  ;;  %v1449_v49 = vld [vmem:[%s3590_s7 + $0x28] sm:$0xff] }
  0xfb   : > { %v746_v5 = vmul.f32 0.1, %v600_v1  ;;  %v775_v6 = vsel %vm711_vm10, %v585_v62, %v743_v0  ;;  %v595_v7 = vadd.f32 %v3146_v20, %v594_v3  ;;  %vm714_vm11 = vcmp.gt.f32.partialorder %v600_v1, 0.0  ;;  %2483 = vmatprep.subr.mxu1 %v1459_v28 }
  0xfc   : > { %2447 = vmatprep.mubr.f32.mxu1 %v775_v6  ;;  %v2375_v8 = vpop.f32.mrf.mxu0  ;;  %v674_v48 = vpop.f32.mrf.mxu1  ;;  %v789_v60 = vsel %vm725_vm7, %v655_v47, %v757_v54  ;;  %vm726_vm8 = vcmp.gt.f32.partialorder %v660_v51, 0.0  ;;  %v759_v61 = vmul.f32 0.1, %v665_v55  ;;  %vm727_vm9 = vcmp.gt.f32.partialorder %v665_v55, 0.0  ;;  %2484 = vmatpush3.msra.mxu1 %v1459_v28  ;;  %v1450_v47 = vld [vmem:[%s3590_s7 + $0x30] sm:$0xff] }
  0xfd   : > { %2448 = vmatmul.mubr.f32.gmra.mxu1 %v776_v2  ;;  %v745_v10 = vmul.f32 0.1, %v595_v7  ;;  %v610_v11 = vadd.f32 %v2375_v8, %v3146_v20  ;;  %vm713_vm12 = vcmp.gt.f32.partialorder %v595_v7, 0.0  ;;  %v778_v12 = vsel %vm714_vm11, %v600_v1, %v746_v5 }
  0xfe   : > { %v604_v13 = vpop.f32.mrf.mxu0  ;;  %v2399_v52 = vpop.f32.mrf.mxu1  ;;  %v675_v62 = vadd.f32 %v3146_v20, %v674_v48  ;;  %v760_v0 = vmul.f32 0.1, %v670_v58  ;;  %v790_v1 = vsel %vm726_vm8, %v660_v51, %v758_v56  ;;  %v680_v2 = vadd.f32 %v2396_v41, %v3146_v20  ;;  %v1453_v41 = vld [vmem:[%s3590_s7 + $0x48] sm:$0xff] }
  0xff   : > { %v748_v15 = vmul.f32 0.1, %v610_v11  ;;  %v777_v16 = vsel %vm713_vm12, %v595_v7, %v745_v10  ;;  %v605_v17 = vadd.f32 %v3146_v20, %v604_v13  ;;  %vm716_vm13 = vcmp.gt.f32.partialorder %v610_v11, 0.0 }
 0x100   : > { %2450 = vmatprep.mubr.f32.mxu1 %v777_v16  ;;  %v2378_v18 = vpop.f32.mrf.mxu0  ;;  %v684_v59 = vpop.f32.mrf.mxu1  ;;  %v791_v3 = vsel %vm727_vm9, %v665_v55, %v759_v61  ;;  %vm728_vm10 = vcmp.gt.f32.partialorder %v670_v58, 0.0  ;;  %v761_v4 = vmul.f32 0.1, %v675_v62  ;;  %vm729_vm11 = vcmp.gt.f32.partialorder %v675_v62, 0.0 }
 0x101   : > { %2451 = vmatmul.mubr.f32.gmra.mxu1 %v778_v12  ;;  %v747_v21 = vmul.f32 0.1, %v605_v17  ;;  %v620_v22 = vadd.f32 %v2378_v18, %v3146_v20  ;;  %vm715_vm14 = vcmp.gt.f32.partialorder %v605_v17, 0.0  ;;  %v780_v23 = vsel %vm716_vm13, %v610_v11, %v748_v15 }
 0x102   : > { %v614_v24 = vpop.f32.mrf.mxu0  ;;  %v2402_v63 = vpop.f32.mrf.mxu1  ;;  %v685_v5 = vadd.f32 %v3146_v20, %v684_v59  ;;  %v762_v7 = vmul.f32 0.1, %v680_v2  ;;  %v792_v8 = vsel %vm728_vm10, %v670_v58, %v760_v0  ;;  %v690_v9 = vadd.f32 %v2399_v52, %v3146_v20 }
 0x103   : > { %v750_v29 = vmul.f32 0.1, %v620_v22  ;;  %v779_v31 = vsel %vm715_vm14, %v605_v17, %v747_v21  ;;  %v615_v32 = vadd.f32 %v3146_v20, %v614_v24  ;;  %vm718_vm15 = vcmp.gt.f32.partialorder %v620_v22, 0.0  ;;  %v1048_v24 = vld [vmem:[%s3588_s5 + $0x8] sm:$0xff] }
 0x104   : > { %2453 = vmatprep.mubr.f32.mxu1 %v779_v31  ;;  %v694_v6 = vpop.f32.mrf.mxu1  ;;  %v793_v10 = vsel %vm729_vm11, %v675_v62, %v761_v4  ;;  %vm730_vm12 = vcmp.gt.f32.partialorder %v680_v2, 0.0  ;;  %v763_v11 = vmul.f32 0.1, %v685_v5  ;;  %vm731_vm13 = vcmp.gt.f32.partialorder %v685_v5, 0.0  ;;  %v3211_v31 = vld [vmem:[%s3587_s4] ss:$0 sm:$0xff] }
 0x105   : > { %2454 = vmatmul.mubr.f32.gmra.mxu1 %v780_v23  ;;  %v749_v33 = vmul.f32 0.1, %v615_v32  ;;  %vm717_vm1 = vcmp.gt.f32.partialorder %v615_v32, 0.0  ;;  %v782_v35 = vsel %vm718_vm15, %v620_v22, %v750_v29  ;;  %v695_v12 = vadd.f32 %v3146_v20, %v694_v6  ;;  %v1050_v23 = vld [vmem:[%s3588_s5 + $0x18] sm:$0xff]  ;;  %v1458_v29 = vld [vmem:[%s3590_s7 + $0x70] sm:$0xff] }
 0x106   : > { %v764_v13 = vmul.f32 0.1, %v690_v9  ;;  %v794_v14 = vsel %vm730_vm12, %v680_v2, %v762_v7  ;;  %v700_v15 = vadd.f32 %v2402_v63, %v3146_v20  ;;  %v795_v16 = vsel %vm731_vm13, %v685_v5, %v763_v11  ;;  %1119 = vmatprep.subr.mxu0 %v1050_v23  ;;  %v1049_v20 = vld [vmem:[%s3588_s5 + $0x10] sm:$0xff]  ;;  %2485 = vmatprep.subr.mxu1 %v1458_v29  ;;  %v1448_v11 = vld [vmem:[%s3590_s7 + $0x20] sm:$0xff] }
 0x107   : > { %v781_v37 = vsel %vm717_vm1, %v615_v32, %v749_v33  ;;  %vm732_vm14 = vcmp.gt.f32.partialorder %v690_v9, 0.0  ;;  %v765_v17 = vmul.f32 0.1, %v695_v12  ;;  %vm733_vm15 = vcmp.gt.f32.partialorder %v695_v12, 0.0  ;;  %1120 = vmatpush1.msra.mxu0 %v1049_v20  ;;  %2486 = vmatpush3.msra.mxu1 %v1458_v29 }
 0x108   : > { %2456 = vmatprep.mubr.f32.mxu1 %v781_v37  ;;  %v766_v18 = vmul.f32 0.1, %v700_v15  ;;  %v796_v19 = vsel %vm732_vm14, %v690_v9, %v764_v13  ;;  %vm734_vm0 = vcmp.gt.f32.partialorder %v700_v15, 0.0  ;;  %1121 = vmatprep.subr.mxu0 %v1048_v24  ;;  %v2814_v26 = vmov 0.0   ;;  %v1455_v37 = vld [vmem:[%s3590_s7 + $0x58] sm:$0xff] }
 0x109   : > { %2457 = vmatmul.mubr.f32.gmra.mxu1 %v782_v35  ;;  %v797_v21 = vsel %vm733_vm15, %v695_v12, %v765_v17  ;;  %1122 = vmatpush1.msra.mxu0 %v1047_v25  ;;  %v1447_v12 = vld [vmem:[%s3590_s7 + $0x18] sm:$0xff] }
 0x10a   : > { %2459 = vmatprep.mubr.f32.mxu1 %v783_v38  ;;  %v798_v22 = vsel %vm734_vm0, %v700_v15, %v766_v18  ;;  %1155 = vmatprep.mubr.f32.mxu0 %v2814_v26  ;;  %v1446_v15 = vld [vmem:[%s3590_s7 + $0x10] sm:$0xff] }
 0x10b   : > { %2487 = vmatprep.subr.mxu1 %v1457_v34 }
 0x10c   : > { %2488 = vmatpush3.msra.mxu1 %v1457_v34 }
 0x10d   : > { %2460 = vmatmul.mubr.f32.gmra.mxu1 %v784_v43  ;;  %2489 = vmatprep.subr.mxu1 %v1456_v36  ;;  %v1452_v43 = vld [vmem:[%s3590_s7 + $0x40] sm:$0xff] }
 0x10e   : > { %2462 = vmatprep.mubr.f32.mxu1 %v785_v46  ;;  %2490 = vmatpush3.msra.mxu1 %v1456_v36  ;;  %v1451_v46 = vld [vmem:[%s3590_s7 + $0x38] sm:$0xff] }
 0x10f   : > { %2491 = vmatprep.subr.mxu1 %v1455_v37 }
 0x110   : > { %2492 = vmatpush3.msra.mxu1 %v1455_v37 }
 0x111   : > { %2463 = vmatmul.mubr.f32.gmra.mxu1 %v786_v50  ;;  %2493 = vmatprep.subr.mxu1 %v1454_v39 }
 0x112   : > { %2465 = vmatprep.mubr.f32.mxu1 %v787_v53  ;;  %2494 = vmatpush3.msra.mxu1 %v1454_v39 }
 0x113   : > { %2495 = vmatprep.subr.mxu1 %v1453_v41 }
 0x114   : > { %2496 = vmatpush3.msra.mxu1 %v1453_v41 }
 0x115   : > { %2466 = vmatmul.mubr.f32.gmra.mxu1 %v788_v57  ;;  %2497 = vmatprep.subr.mxu1 %v1452_v43 }
 0x116   : > { %2468 = vmatprep.mubr.f32.mxu1 %v789_v60  ;;  %2498 = vmatpush3.msra.mxu1 %v1452_v43 }
 0x117   : > { %2499 = vmatprep.subr.mxu1 %v1451_v46 }
 0x118   : > { %2500 = vmatpush3.msra.mxu1 %v1451_v46 }
 0x119   : > { %2469 = vmatmul.mubr.f32.gmra.mxu1 %v790_v1  ;;  %2501 = vmatprep.subr.mxu1 %v1450_v47 }
 0x11a   : > { %2471 = vmatprep.mubr.f32.mxu1 %v791_v3  ;;  %2502 = vmatpush3.msra.mxu1 %v1450_v47  ;;  %v1081_v47 = vlaneseq }
 0x11b   : > { %2503 = vmatprep.subr.mxu1 %v1449_v49 }
 0x11c   : > { %2504 = vmatpush3.msra.mxu1 %v1449_v49 }
 0x11d   : > { %2472 = vmatmul.mubr.f32.gmra.mxu1 %v792_v8  ;;  %2505 = vmatprep.subr.mxu1 %v1448_v11 }
 0x11e   : > { %2474 = vmatprep.mubr.f32.mxu1 %v793_v10  ;;  %2506 = vmatpush3.msra.mxu1 %v1448_v11 }
 0x11f   : > { %2507 = vmatprep.subr.mxu1 %v1447_v12 }
 0x120   : > { %2508 = vmatpush3.msra.mxu1 %v1447_v12 }
 0x121   : > { %2475 = vmatmul.mubr.f32.gmra.mxu1 %v794_v14  ;;  %2509 = vmatprep.subr.mxu1 %v1446_v15 }
 0x122   : > { %2477 = vmatprep.mubr.f32.mxu1 %v795_v16  ;;  %2510 = vmatpush3.msra.mxu1 %v1446_v15  ;;  %v1445_v16 = vld [vmem:[%s3590_s7 + $0x8] sm:$0xff] }
 0x123   : > { %2511 = vmatprep.subr.mxu1 %v1445_v16 }
 0x124   : > { %2512 = vmatpush3.msra.mxu1 %v1445_v16 }
 0x125   : > { %2478 = vmatmul.mubr.f32.gmra.mxu1 %v796_v19  ;;  %v1444_v19 = vld [vmem:[%s3590_s7] sm:$0xff] }
 0x126   : > { %2480 = vmatprep.mubr.f32.mxu1 %v797_v21  ;;  %2513 = vmatprep.subr.mxu1 %v1444_v19 }
 0x127   : > { %2514 = vmatpush3.msra.mxu1 %v1444_v19 }
 0x129   : > { %2481 = vmatmul.mubr.f32.gmra.mxu1 %v798_v22 }
 0x1ad   : > { %v2437_v27 = vpop.f32.mrf.mxu1 }
 0x1ae   : > { %v894_v30 = vadd.f32 %v2437_v27, %v3211_v31 }
 0x1af   : > { %v888_v32 = vpop.f32.mrf.mxu1 }
 0x1b0   : > { %v889_v33 = vadd.f32 %v3211_v31, %v888_v32 }
 0x1b1   : > { %v2440_v35 = vpop.f32.mrf.mxu1 }
 0x1b2   : > { %1156 = vmatmul.mubr.f32.vlgmr.msra.gmra.mxu0 %v889_v33  ;;  %v904_v44 = vadd.f32 %v2440_v35, %v3211_v31 }
 0x1b3   : > { %1161 = vmatprep.mubr.f32.mxu0 %v2814_v26  ;;  %v898_v38 = vpop.f32.mrf.mxu1 }
 0x1b4   : > { %v899_v40 = vadd.f32 %v3211_v31, %v898_v38  ;;  %v2815_v38 = vmov 0  }
 0x1b5   : > { %v2443_v42 = vpop.f32.mrf.mxu1  ;;  %2622 = vset.pattern.permute.xlu0 %v2815_v38  ;;  %2623 = vset.pattern.permute.xlu1 %v2815_v38 }
 0x1b6   : > { %1162 = vmatmul.mubr.f32.gmra.mxu0 %v894_v30  ;;  %v914_v51 = vadd.f32 %v2443_v42, %v3211_v31 }
 0x1b7   : > { %1167 = vmatprep.mubr.f32.mxu0 %v2814_v26  ;;  %v908_v45 = vpop.f32.mrf.mxu1 }
 0x1b8   : > { %v909_v48 = vadd.f32 %v3211_v31, %v908_v45 }
 0x1b9   : > { %v2446_v50 = vpop.f32.mrf.mxu1 }
 0x1ba   : > { %1168 = vmatmul.mubr.f32.gmra.mxu0 %v899_v40  ;;  %v924_v55 = vadd.f32 %v2446_v50, %v3211_v31  ;;  %v1079_v50 = vld [vmem:[%s3589_s6] sm:$0x3] }
 0x1bb   : > { %1173 = vmatprep.mubr.f32.mxu0 %v2814_v26  ;;  %v918_v52 = vpop.f32.mrf.mxu1 }
 0x1bc   : > { %v919_v53 = vadd.f32 %v3211_v31, %v918_v52 }
 0x1bd   : > { %v2449_v54 = vpop.f32.mrf.mxu1 }
 0x1be   : > { %1174 = vmatmul.mubr.f32.gmra.mxu0 %v904_v44  ;;  %v934_v59 = vadd.f32 %v2449_v54, %v3211_v31 }
 0x1bf   : > { %1179 = vmatprep.mubr.f32.mxu0 %v2814_v26  ;;  %v928_v56 = vpop.f32.mrf.mxu1 }
 0x1c0   : > { %v929_v57 = vadd.f32 %v3211_v31, %v928_v56 }
 0x1c1   : > { %v2452_v58 = vpop.f32.mrf.mxu1 }
 0x1c2   : > { %1180 = vmatmul.mubr.f32.gmra.mxu0 %v909_v48  ;;  %v944_v63 = vadd.f32 %v2452_v58, %v3211_v31  ;;  %v1082_v48 = vshrl.u32 %v1081_v47, 7 }
 0x1c3   : > { %1185 = vmatprep.mubr.f32.mxu0 %v2814_v26  ;;  %v938_v60 = vpop.f32.mrf.mxu1 }
 0x1c4   : > { %v939_v61 = vadd.f32 %v3211_v31, %v938_v60  ;;  %v1083_v49 = vsub.s32 0, %v1082_v48 }
 0x1c5   : > { %v2455_v62 = vpop.f32.mrf.mxu1 }
 0x1c6   : > { %1186 = vmatmul.mubr.f32.gmra.mxu0 %v914_v51  ;;  %v954_v3 = vadd.f32 %v2455_v62, %v3211_v31  ;;  %v1087_v51 = vsub.s32 1, %v1082_v48  ;;  %v3322_v52 = vrot.slane %v1079_v50, %v1083_v49 }
 0x1c7   : > { %1191 = vmatprep.mubr.f32.mxu0 %v2814_v26  ;;  %v948_v0 = vpop.f32.mrf.mxu1 }
 0x1c8   : > { %v949_v1 = vadd.f32 %v3211_v31, %v948_v0 }
 0x1c9   : > { %v2458_v2 = vpop.f32.mrf.mxu1 }
 0x1ca   : > { %1192 = vmatmul.mubr.f32.gmra.mxu0 %v919_v53  ;;  %v964_v7 = vadd.f32 %v2458_v2, %v3211_v31  ;;  %v3324_v53 = vrot.slane %v1079_v50, %v1087_v51 }
 0x1cb   : > { %1197 = vmatprep.mubr.f32.mxu0 %v2814_v26  ;;  %v958_v4 = vpop.f32.mrf.mxu1 }
 0x1cc   : > { %v959_v5 = vadd.f32 %v3211_v31, %v958_v4 }
 0x1cd   : > { %v2461_v6 = vpop.f32.mrf.mxu1 }
 0x1ce   : > { %1198 = vmatmul.mubr.f32.gmra.mxu0 %v924_v55  ;;  %v974_v13 = vadd.f32 %v2461_v6, %v3211_v31 }
 0x1cf   : > { %1203 = vmatprep.mubr.f32.mxu0 %v2814_v26  ;;  %v968_v8 = vpop.f32.mrf.mxu1 }
 0x1d0   : > { %v969_v9 = vadd.f32 %v3211_v31, %v968_v8 }
 0x1d1   : > { %v2464_v10 = vpop.f32.mrf.mxu1 }
 0x1d2   : > { %1204 = vmatmul.mubr.f32.gmra.mxu0 %v929_v57  ;;  %v984_v21 = vadd.f32 %v2464_v10, %v3211_v31 }
 0x1d3   : > { %1209 = vmatprep.mubr.f32.mxu0 %v2814_v26  ;;  %v978_v14 = vpop.f32.mrf.mxu1 }
 0x1d4   : > { %v979_v17 = vadd.f32 %v3211_v31, %v978_v14 }
 0x1d5   : > { %v2467_v18 = vpop.f32.mrf.mxu1 }
 0x1d6   : > { %1210 = vmatmul.mubr.f32.gmra.mxu0 %v934_v59  ;;  %v994_v24 = vadd.f32 %v2467_v18, %v3211_v31 }
 0x1d7   : > { %1215 = vmatprep.mubr.f32.mxu0 %v2814_v26  ;;  %v988_v22 = vpop.f32.mrf.mxu1 }
 0x1d8   : > { %v989_v23 = vadd.f32 %v3211_v31, %v988_v22 }
 0x1d9   : > { %v2470_v20 = vpop.f32.mrf.mxu1 }
 0x1da   : > { %1216 = vmatmul.mubr.f32.gmra.mxu0 %v939_v61  ;;  %v1004_v29 = vadd.f32 %v2470_v20, %v3211_v31 }
 0x1db   : > { %1221 = vmatprep.mubr.f32.mxu0 %v2814_v26  ;;  %v998_v25 = vpop.f32.mrf.mxu1 }
 0x1dc   : > { %v999_v27 = vadd.f32 %v3211_v31, %v998_v25 }
 0x1dd   : > { %v2473_v28 = vpop.f32.mrf.mxu1 }
 0x1de   : > { %1222 = vmatmul.mubr.f32.gmra.mxu0 %v944_v63  ;;  %v1014_v35 = vadd.f32 %v2473_v28, %v3211_v31 }
 0x1df   : > { %1227 = vmatprep.mubr.f32.mxu0 %v2814_v26  ;;  %v1008_v32 = vpop.f32.mrf.mxu1 }
 0x1e0   : > { %v1009_v33 = vadd.f32 %v3211_v31, %v1008_v32 }
 0x1e1   : > { %v2476_v34 = vpop.f32.mrf.mxu1 }
 0x1e2   : > { %1228 = vmatmul.mubr.f32.gmra.mxu0 %v949_v1  ;;  %v1024_v39 = vadd.f32 %v2476_v34, %v3211_v31 }
 0x1e3   : > { %1233 = vmatprep.mubr.f32.mxu0 %v2814_v26  ;;  %v1018_v36 = vpop.f32.mrf.mxu1 }
 0x1e4   : > { %v1019_v30 = vadd.f32 %v3211_v31, %v1018_v36 }
 0x1e5   : > { %v2479_v37 = vpop.f32.mrf.mxu1 }
 0x1e6   : > { %1234 = vmatmul.mubr.f32.gmra.mxu0 %v954_v3  ;;  %v1034_v43 = vadd.f32 %v2479_v37, %v3211_v31 }
 0x1e7   : > { %1239 = vmatprep.mubr.f32.mxu0 %v2814_v26  ;;  %v1028_v40 = vpop.f32.mrf.mxu1 }
 0x1e8   : > { %v1029_v41 = vadd.f32 %v3211_v31, %v1028_v40 }
 0x1e9   : > { %v2482_v42 = vpop.f32.mrf.mxu1 }
 0x1ea   : > { %1240 = vmatmul.mubr.f32.gmra.mxu0 %v959_v5  ;;  %v1044_v45 = vadd.f32 %v2482_v42, %v3211_v31 }
 0x1eb   : > { %1245 = vmatprep.mubr.f32.mxu0 %v2814_v26  ;;  %v1038_v44 = vpop.f32.mrf.mxu1 }
 0x1ec   : > { %v1039_v46 = vadd.f32 %v3211_v31, %v1038_v44 }
 0x1ee   : > { %1246 = vmatmul.mubr.f32.gmra.mxu0 %v964_v7 }
 0x1ef   : > { %1251 = vmatprep.mubr.f32.mxu0 %v2814_v26 }
 0x1f2   : > { %1252 = vmatmul.mubr.f32.gmra.mxu0 %v969_v9 }
 0x1f3   : > { %1257 = vmatprep.mubr.f32.mxu0 %v2814_v26 }
 0x1f6   : > { %1258 = vmatmul.mubr.f32.gmra.mxu0 %v974_v13 }
 0x1f7   : > { %1263 = vmatprep.mubr.f32.mxu0 %v2814_v26 }
 0x1fa   : > { %1264 = vmatmul.mubr.f32.gmra.mxu0 %v979_v17 }
 0x1fb   : > { %1269 = vmatprep.mubr.f32.mxu0 %v2814_v26 }
 0x1fe   : > { %1270 = vmatmul.mubr.f32.gmra.mxu0 %v984_v21 }
 0x1ff   : > { %1275 = vmatprep.mubr.f32.mxu0 %v2814_v26 }
 0x202   : > { %1276 = vmatmul.mubr.f32.gmra.mxu0 %v989_v23 }
 0x203   : > { %1281 = vmatprep.mubr.f32.mxu0 %v2814_v26 }
 0x206   : > { %1282 = vmatmul.mubr.f32.gmra.mxu0 %v994_v24 }
 0x207   : > { %1287 = vmatprep.mubr.f32.mxu0 %v2814_v26 }
 0x20a   : > { %1288 = vmatmul.mubr.f32.gmra.mxu0 %v999_v27 }
 0x20b   : > { %1293 = vmatprep.mubr.f32.mxu0 %v2814_v26 }
 0x20e   : > { %1294 = vmatmul.mubr.f32.gmra.mxu0 %v1004_v29 }
 0x20f   : > { %1299 = vmatprep.mubr.f32.mxu0 %v2814_v26 }
 0x212   : > { %1300 = vmatmul.mubr.f32.gmra.mxu0 %v1009_v33 }
 0x213   : > { %1305 = vmatprep.mubr.f32.mxu0 %v2814_v26 }
 0x216   : > { %1306 = vmatmul.mubr.f32.gmra.mxu0 %v1014_v35 }
 0x217   : > { %1311 = vmatprep.mubr.f32.mxu0 %v2814_v26 }
 0x21a   : > { %1312 = vmatmul.mubr.f32.gmra.mxu0 %v1019_v30 }
 0x21b   : > { %1317 = vmatprep.mubr.f32.mxu0 %v2814_v26 }
 0x21e   : > { %1318 = vmatmul.mubr.f32.gmra.mxu0 %v1024_v39 }
 0x21f   : > { %1323 = vmatprep.mubr.f32.mxu0 %v2814_v26 }
 0x222   : > { %1324 = vmatmul.mubr.f32.gmra.mxu0 %v1029_v41 }
 0x223   : > { %1329 = vmatprep.mubr.f32.mxu0 %v2814_v26 }
 0x226   : > { %1330 = vmatmul.mubr.f32.gmra.mxu0 %v1034_v43 }
 0x227   : > { %1335 = vmatprep.mubr.f32.mxu0 %v2814_v26 }
 0x22a   : > { %1336 = vmatmul.mubr.f32.gmra.mxu0 %v1039_v46 }
 0x22b   : > { %1341 = vmatprep.mubr.f32.mxu0 %v2814_v26 }
 0x22e   : > { %1342 = vmatmul.mubr.f32.gmra.mxu0 %v1044_v45 }
 0x272   : > { %v1157_v54 = vpop.f32.mrf.mxu0 }
 0x273   : > { %v1158_v55 = vadd.f32 %v1157_v54, %v3322_v52 }
 0x274   : > { %v1159_v26 = vpop.f32.mrf.mxu0 }
 0x275   : > { %v1380_v56 = vmul.f32 0.1, %v1158_v55  ;;  %v1160_v31 = vadd.f32 %v1159_v26, %v3324_v53  ;;  %vm1348_vm1 = vcmp.gt.f32.partialorder %v1158_v55, 0.0 }
 0x276   : > { %v1163_v57 = vpop.f32.mrf.mxu0 }
 0x277   : > { %v1692_v58 = vsub.f32 0.0, %v1160_v31  ;;  %v1164_v59 = vadd.f32 %v1163_v57, %v3322_v52  ;;  %v1412_v60 = vsel %vm1348_vm1, %v1158_v55, %v1380_v56 }
 0x278   : > { %v1165_v61 = vpop.f32.mrf.mxu0  ;;  %2515 = vmatprep.mubr.f32.mxu1 %v1412_v60 }
 0x279   : > { %v1724_v62 = vmul.f32 1.442695, %v1692_v58  ;;  %vm1349_vm2 = vcmp.gt.f32.partialorder %v1164_v59, 0.0  ;;  %v1381_v63 = vmul.f32 0.1, %v1164_v59  ;;  %v1166_v0 = vadd.f32 %v1165_v61, %v3324_v53 }
 0x27a   : > { %v1169_v1 = vpop.f32.mrf.mxu0 }
 0x27b   : > { %2624 = vpow2.f32 %v1724_v62  ;;  %v1413_v2 = vsel %vm1349_vm2, %v1164_v59, %v1381_v63  ;;  %v1693_v3 = vsub.f32 0.0, %v1166_v0  ;;  %v1170_v4 = vadd.f32 %v1169_v1, %v3322_v52 }
 0x27c   : > { %v1171_v5 = vpop.f32.mrf.mxu0  ;;  %2516 = vmatmul.mubr.f32.vlgmr.msra.gmra.mxu1 %v1413_v2 }
 0x27d   : > { %v1726_v6 = vmul.f32 1.442695, %v1693_v3  ;;  %v1382_v7 = vmul.f32 0.1, %v1170_v4  ;;  %v1172_v8 = vadd.f32 %v1171_v5, %v3324_v53  ;;  %vm1350_vm3 = vcmp.gt.f32.partialorder %v1170_v4, 0.0 }
 0x27e   : > { %v1175_v9 = vpop.f32.mrf.mxu0 }
 0x27f   : > { %2626 = vpow2.f32 %v1726_v6  ;;  %v1694_v10 = vsub.f32 0.0, %v1172_v8  ;;  %v1176_v11 = vadd.f32 %v1175_v9, %v3322_v52  ;;  %v1414_v12 = vsel %vm1350_vm3, %v1170_v4, %v1382_v7 }
 0x280   : > { %v1177_v13 = vpop.f32.mrf.mxu0  ;;  %2518 = vmatprep.mubr.f32.mxu1 %v1414_v12 }
 0x281   : > { %v1728_v14 = vmul.f32 1.442695, %v1694_v10  ;;  %v1383_v15 = vmul.f32 0.1, %v1176_v11  ;;  %v1178_v16 = vadd.f32 %v1177_v13, %v3324_v53  ;;  %vm1351_vm4 = vcmp.gt.f32.partialorder %v1176_v11, 0.0 }
 0x282   : > { %v1181_v17 = vpop.f32.mrf.mxu0 }
 0x283   : > { %2628 = vpow2.f32 %v1728_v14  ;;  %v1695_v18 = vsub.f32 0.0, %v1178_v16  ;;  %v1182_v19 = vadd.f32 %v1181_v17, %v3322_v52  ;;  %v1415_v21 = vsel %vm1351_vm4, %v1176_v11, %v1383_v15 }
 0x284   : > { %v1183_v22 = vpop.f32.mrf.mxu0  ;;  %2519 = vmatmul.mubr.f32.gmra.mxu1 %v1415_v21 }
 0x285   : > { %v1730_v23 = vmul.f32 1.442695, %v1695_v18  ;;  %v1384_v20 = vmul.f32 0.1, %v1182_v19  ;;  %v1184_v24 = vadd.f32 %v1183_v22, %v3324_v53  ;;  %vm1352_vm5 = vcmp.gt.f32.partialorder %v1182_v19, 0.0 }
 0x286   : > { %v1187_v25 = vpop.f32.mrf.mxu0 }
 0x287   : > { %2630 = vpow2.f32 %v1730_v23  ;;  %v1696_v27 = vsub.f32 0.0, %v1184_v24  ;;  %v1188_v28 = vadd.f32 %v1187_v25, %v3322_v52  ;;  %v1416_v29 = vsel %vm1352_vm5, %v1182_v19, %v1384_v20 }
 0x288   : > { %v2625_v32 = vpop.eup %2624  ;;  %v1189_v33 = vpop.f32.mrf.mxu0  ;;  %2521 = vmatprep.mubr.f32.mxu1 %v1416_v29 }
 0x289   : > { %v1788_v34 = vadd.f32 1.0, %v2625_v32  ;;  %v1732_v35 = vmul.f32 1.442695, %v1696_v27  ;;  %v1385_v36 = vmul.f32 0.1, %v1188_v28  ;;  %v1190_v30 = vadd.f32 %v1189_v33, %v3324_v53 }
 0x28a   : > { %v1193_v37 = vpop.f32.mrf.mxu0  ;;  %vm1353_vm6 = vcmp.gt.f32.partialorder %v1188_v28, 0.0 }
 0x28b   : > { %2632 = vrcp.f32 %v1788_v34  ;;  %v1697_v38 = vsub.f32 0.0, %v1190_v30  ;;  %v1194_v39 = vadd.f32 %v1193_v37, %v3322_v52  ;;  %v1417_v40 = vsel %vm1353_vm6, %v1188_v28, %v1385_v36 }
 0x28c   : > { %v2627_v41 = vpop.eup %2626  ;;  %2634 = vpow2.f32 %v1732_v35  ;;  %v1195_v42 = vpop.f32.mrf.mxu0  ;;  %2522 = vmatmul.mubr.f32.gmra.mxu1 %v1417_v40 }
 0x28d   : > { %v1789_v43 = vadd.f32 1.0, %v2627_v41  ;;  %v1734_v44 = vmul.f32 1.442695, %v1697_v38  ;;  %v1386_v46 = vmul.f32 0.1, %v1194_v39  ;;  %v1196_v45 = vadd.f32 %v1195_v42, %v3324_v53 }
 0x28e   : > { %v1199_v48 = vpop.f32.mrf.mxu0  ;;  %vm1354_vm7 = vcmp.gt.f32.partialorder %v1194_v39, 0.0 }
 0x28f   : > { %2636 = vrcp.f32 %v1789_v43  ;;  %v1698_v49 = vsub.f32 0.0, %v1196_v45  ;;  %v1200_v50 = vadd.f32 %v1199_v48, %v3322_v52  ;;  %v1418_v51 = vsel %vm1354_vm7, %v1194_v39, %v1386_v46 }
 0x290   : > { %v2629_v54 = vpop.eup %2628  ;;  %2638 = vpow2.f32 %v1734_v44  ;;  %v1201_v55 = vpop.f32.mrf.mxu0  ;;  %2524 = vmatprep.mubr.f32.mxu1 %v1418_v51 }
 0x291   : > { %v1790_v26 = vadd.f32 1.0, %v2629_v54  ;;  %v1736_v56 = vmul.f32 1.442695, %v1698_v49  ;;  %v1387_v31 = vmul.f32 0.1, %v1200_v50  ;;  %v1202_v57 = vadd.f32 %v1201_v55, %v3324_v53 }
 0x292   : > { %v1205_v58 = vpop.f32.mrf.mxu0  ;;  %vm1355_vm8 = vcmp.gt.f32.partialorder %v1200_v50, 0.0 }
 0x293   : > { %2640 = vrcp.f32 %v1790_v26  ;;  %v1699_v59 = vsub.f32 0.0, %v1202_v57  ;;  %v1206_v60 = vadd.f32 %v1205_v58, %v3322_v52  ;;  %v1419_v61 = vsel %vm1355_vm8, %v1200_v50, %v1387_v31 }
 0x294   : > { %v2631_v62 = vpop.eup %2630  ;;  %2642 = vpow2.f32 %v1736_v56  ;;  %v1207_v63 = vpop.f32.mrf.mxu0  ;;  %2525 = vmatmul.mubr.f32.gmra.mxu1 %v1419_v61 }
 0x295   : > { %v1791_v0 = vadd.f32 1.0, %v2631_v62  ;;  %v1738_v1 = vmul.f32 1.442695, %v1699_v59  ;;  %v1388_v2 = vmul.f32 0.1, %v1206_v60  ;;  %v1208_v3 = vadd.f32 %v1207_v63, %v3324_v53 }
 0x296   : > { %v1211_v4 = vpop.f32.mrf.mxu0  ;;  %vm1356_vm9 = vcmp.gt.f32.partialorder %v1206_v60, 0.0 }
 0x297   : > { %2644 = vrcp.f32 %v1791_v0  ;;  %v1700_v5 = vsub.f32 0.0, %v1208_v3  ;;  %v1212_v6 = vadd.f32 %v1211_v4, %v3322_v52  ;;  %v1420_v7 = vsel %vm1356_vm9, %v1206_v60, %v1388_v2 }
 0x298   : > { %v2633_v8 = vpop.eup %2632  ;;  %2646 = vpow2.f32 %v1738_v1  ;;  %v1213_v9 = vpop.f32.mrf.mxu0  ;;  %2527 = vmatprep.mubr.f32.mxu1 %v1420_v7 }
 0x299   : > { %v2635_v10 = vpop.eup %2634  ;;  %v1740_v11 = vmul.f32 1.442695, %v1700_v5  ;;  %v1389_v12 = vmul.f32 0.1, %v1212_v6  ;;  %v1214_v13 = vadd.f32 %v1213_v9, %v3324_v53  ;;  %1857 = vperm.xlu0 %2622, %v2633_v8   ;;  %vm1357_vm10 = vcmp.gt.f32.partialorder %v1212_v6, 0.0 }
 0x29a   : > { %v1792_v14 = vadd.f32 1.0, %v2635_v10  ;;  %v1217_v15 = vpop.f32.mrf.mxu0 }
 0x29b   : > { %2648 = vpow2.f32 %v1740_v11  ;;  %v1701_v16 = vsub.f32 0.0, %v1214_v13  ;;  %v1218_v17 = vadd.f32 %v1217_v15, %v3322_v52  ;;  %v1421_v18 = vsel %vm1357_vm10, %v1212_v6, %v1389_v12 }
 0x29c   : > { %v2637_v19 = vpop.eup %2636  ;;  %2650 = vrcp.f32 %v1792_v14  ;;  %v1219_v21 = vpop.f32.mrf.mxu0  ;;  %2528 = vmatmul.mubr.f32.gmra.mxu1 %v1421_v18 }
 0x29d   : > { %v2639_v22 = vpop.eup %2638  ;;  %v1742_v23 = vmul.f32 1.442695, %v1701_v16  ;;  %v1390_v20 = vmul.f32 0.1, %v1218_v17  ;;  %v1220_v24 = vadd.f32 %v1219_v21, %v3324_v53  ;;  %1862 = vperm.xlu0 %2622, %v2637_v19   ;;  %vm1358_vm11 = vcmp.gt.f32.partialorder %v1218_v17, 0.0 }
 0x29e   : > { %v1793_v25 = vadd.f32 1.0, %v2639_v22  ;;  %v1223_v27 = vpop.f32.mrf.mxu0 }
 0x29f   : > { %2652 = vpow2.f32 %v1742_v23  ;;  %v1702_v28 = vsub.f32 0.0, %v1220_v24  ;;  %v1224_v29 = vadd.f32 %v1223_v27, %v3322_v52  ;;  %v1422_v32 = vsel %vm1358_vm11, %v1218_v17, %v1390_v20 }
 0x2a0   : > { %v2641_v33 = vpop.eup %2640  ;;  %2654 = vrcp.f32 %v1793_v25  ;;  %v1225_v34 = vpop.f32.mrf.mxu0  ;;  %2530 = vmatprep.mubr.f32.mxu1 %v1422_v32 }
 0x2a1   : > { %v2643_v35 = vpop.eup %2642  ;;  %v1744_v36 = vmul.f32 1.442695, %v1702_v28  ;;  %v1391_v30 = vmul.f32 0.1, %v1224_v29  ;;  %v1226_v37 = vadd.f32 %v1225_v34, %v3324_v53  ;;  %1867 = vperm.xlu1 %2623, %v2641_v33   ;;  %vm1359_vm12 = vcmp.gt.f32.partialorder %v1224_v29, 0.0 }
 0x2a2   : > { %v1794_v38 = vadd.f32 1.0, %v2643_v35  ;;  %v1229_v39 = vpop.f32.mrf.mxu0 }
 0x2a3   : > { %2656 = vpow2.f32 %v1744_v36  ;;  %v1703_v40 = vsub.f32 0.0, %v1226_v37  ;;  %v1230_v41 = vadd.f32 %v1229_v39, %v3322_v52  ;;  %v1423_v42 = vsel %vm1359_vm12, %v1224_v29, %v1391_v30 }
 0x2a4   : > { %v2645_v43 = vpop.eup %2644  ;;  %2658 = vrcp.f32 %v1794_v38  ;;  %v1231_v44 = vpop.f32.mrf.mxu0  ;;  %2531 = vmatmul.mubr.f32.gmra.mxu1 %v1423_v42 }
 0x2a5   : > { %v2647_v46 = vpop.eup %2646  ;;  %v1746_v45 = vmul.f32 1.442695, %v1703_v40  ;;  %v1392_v48 = vmul.f32 0.1, %v1230_v41  ;;  %v1232_v49 = vadd.f32 %v1231_v44, %v3324_v53  ;;  %1872 = vperm.xlu1 %2623, %v2645_v43   ;;  %vm1360_vm13 = vcmp.gt.f32.partialorder %v1230_v41, 0.0 }
 0x2a6   : > { %v1795_v50 = vadd.f32 1.0, %v2647_v46  ;;  %v1235_v51 = vpop.f32.mrf.mxu0 }
 0x2a7   : > { %2660 = vpow2.f32 %v1746_v45  ;;  %v1704_v54 = vsub.f32 0.0, %v1232_v49  ;;  %v1236_v55 = vadd.f32 %v1235_v51, %v3322_v52  ;;  %v1424_v26 = vsel %vm1360_vm13, %v1230_v41, %v1392_v48 }
 0x2a8   : > { %v2649_v56 = vpop.eup %2648  ;;  %2662 = vrcp.f32 %v1795_v50  ;;  %v1237_v31 = vpop.f32.mrf.mxu0  ;;  %2533 = vmatprep.mubr.f32.mxu1 %v1424_v26 }
 0x2a9   : > { %v2651_v57 = vpop.eup %2650  ;;  %v1796_v58 = vadd.f32 1.0, %v2649_v56  ;;  %v1748_v59 = vmul.f32 1.442695, %v1704_v54  ;;  %v1393_v60 = vmul.f32 0.1, %v1236_v55  ;;  %v1238_v61 = vadd.f32 %v1237_v31, %v3324_v53 }
 0x2aa   : > { %1877 = vperm.xlu0 %2622, %v2651_v57   ;;  %v1241_v62 = vpop.f32.mrf.mxu0  ;;  %vm1361_vm14 = vcmp.gt.f32.partialorder %v1236_v55, 0.0 }
 0x2ab   : > { %2664 = vrcp.f32 %v1796_v58  ;;  %v1705_v63 = vsub.f32 0.0, %v1238_v61  ;;  %v1242_v0 = vadd.f32 %v1241_v62, %v3322_v52  ;;  %v1425_v1 = vsel %vm1361_vm14, %v1236_v55, %v1393_v60 }
 0x2ac   : > { %v2653_v2 = vpop.eup %2652  ;;  %2666 = vpow2.f32 %v1748_v59  ;;  %v1243_v3 = vpop.f32.mrf.mxu0  ;;  %2534 = vmatmul.mubr.f32.gmra.mxu1 %v1425_v1 }
 0x2ad   : > { %v2655_v4 = vpop.eup %2654  ;;  %v1797_v5 = vadd.f32 1.0, %v2653_v2  ;;  %v1750_v6 = vmul.f32 1.442695, %v1705_v63  ;;  %v1394_v7 = vmul.f32 0.1, %v1242_v0  ;;  %v1244_v8 = vadd.f32 %v1243_v3, %v3324_v53 }
 0x2ae   : > { %1882 = vperm.xlu1 %2623, %v2655_v4   ;;  %v1247_v9 = vpop.f32.mrf.mxu0  ;;  %vm1362_vm15 = vcmp.gt.f32.partialorder %v1242_v0, 0.0 }
 0x2af   : > { %2668 = vrcp.f32 %v1797_v5  ;;  %v1706_v10 = vsub.f32 0.0, %v1244_v8  ;;  %v1248_v11 = vadd.f32 %v1247_v9, %v3322_v52  ;;  %v1426_v12 = vsel %vm1362_vm15, %v1242_v0, %v1394_v7 }
 0x2b0   : > { %v2657_v13 = vpop.eup %2656  ;;  %2670 = vpow2.f32 %v1750_v6  ;;  %v1249_v14 = vpop.f32.mrf.mxu0  ;;  %2536 = vmatprep.mubr.f32.mxu1 %v1426_v12 }
 0x2b1   : > { %v2659_v15 = vpop.eup %2658  ;;  %v1798_v16 = vadd.f32 1.0, %v2657_v13  ;;  %v1752_v17 = vmul.f32 1.442695, %v1706_v10  ;;  %v1395_v18 = vmul.f32 0.1, %v1248_v11  ;;  %v1250_v19 = vadd.f32 %v1249_v14, %v3324_v53 }
 0x2b2   : > { %1887 = vperm.xlu0 %2622, %v2659_v15   ;;  %v1253_v21 = vpop.f32.mrf.mxu0  ;;  %vm1363_vm0 = vcmp.gt.f32.partialorder %v1248_v11, 0.0 }
 0x2b3   : > { %2672 = vrcp.f32 %v1798_v16  ;;  %v1707_v22 = vsub.f32 0.0, %v1250_v19  ;;  %v1254_v23 = vadd.f32 %v1253_v21, %v3322_v52  ;;  %v1427_v20 = vsel %vm1363_vm0, %v1248_v11, %v1395_v18 }
 0x2b4   : > { %v2661_v24 = vpop.eup %2660  ;;  %2674 = vpow2.f32 %v1752_v17  ;;  %v1255_v25 = vpop.f32.mrf.mxu0  ;;  %2537 = vmatmul.mubr.f32.gmra.mxu1 %v1427_v20 }
 0x2b5   : > { %v2663_v27 = vpop.eup %2662  ;;  %v1799_v28 = vadd.f32 1.0, %v2661_v24  ;;  %v1754_v29 = vmul.f32 1.442695, %v1707_v22  ;;  %v1396_v32 = vmul.f32 0.1, %v1254_v23  ;;  %v1256_v33 = vadd.f32 %v1255_v25, %v3324_v53 }
 0x2b6   : > { %1892 = vperm.xlu1 %2623, %v2663_v27   ;;  %v1259_v34 = vpop.f32.mrf.mxu0  ;;  %vm1364_vm1 = vcmp.gt.f32.partialorder %v1254_v23, 0.0 }
 0x2b7   : > { %2676 = vrcp.f32 %v1799_v28  ;;  %v1708_v35 = vsub.f32 0.0, %v1256_v33  ;;  %v1260_v36 = vadd.f32 %v1259_v34, %v3322_v52  ;;  %v1428_v30 = vsel %vm1364_vm1, %v1254_v23, %v1396_v32 }
 0x2b8   : > { %v2665_v37 = vpop.eup %2664  ;;  %2678 = vpow2.f32 %v1754_v29  ;;  %v1261_v38 = vpop.f32.mrf.mxu0  ;;  %2539 = vmatprep.mubr.f32.mxu1 %v1428_v30 }
 0x2b9   : > { %v2667_v39 = vpop.eup %2666  ;;  %v1756_v40 = vmul.f32 1.442695, %v1708_v35  ;;  %v1397_v41 = vmul.f32 0.1, %v1260_v36  ;;  %v1262_v42 = vadd.f32 %v1261_v38, %v3324_v53  ;;  %1897 = vperm.xlu0 %2622, %v2665_v37   ;;  %vm1365_vm2 = vcmp.gt.f32.partialorder %v1260_v36, 0.0 }
 0x2ba   : > { %v1800_v43 = vadd.f32 1.0, %v2667_v39  ;;  %v1265_v44 = vpop.f32.mrf.mxu0 }
 0x2bb   : > { %2680 = vpow2.f32 %v1756_v40  ;;  %v1709_v46 = vsub.f32 0.0, %v1262_v42  ;;  %v1266_v45 = vadd.f32 %v1265_v44, %v3322_v52  ;;  %v1429_v48 = vsel %vm1365_vm2, %v1260_v36, %v1397_v41 }
 0x2bc   : > { %v2669_v49 = vpop.eup %2668  ;;  %2682 = vrcp.f32 %v1800_v43  ;;  %v1267_v50 = vpop.f32.mrf.mxu0  ;;  %2540 = vmatmul.mubr.f32.gmra.mxu1 %v1429_v48 }
 0x2bd   : > { %v2671_v51 = vpop.eup %2670  ;;  %v1758_v54 = vmul.f32 1.442695, %v1709_v46  ;;  %v1398_v55 = vmul.f32 0.1, %v1266_v45  ;;  %v1268_v26 = vadd.f32 %v1267_v50, %v3324_v53  ;;  %1902 = vperm.xlu1 %2623, %v2669_v49   ;;  %vm1366_vm3 = vcmp.gt.f32.partialorder %v1266_v45, 0.0 }
 0x2be   : > { %v1801_v56 = vadd.f32 1.0, %v2671_v51  ;;  %v1271_v31 = vpop.f32.mrf.mxu0 }
 0x2bf   : > { %2684 = vpow2.f32 %v1758_v54  ;;  %v1710_v57 = vsub.f32 0.0, %v1268_v26  ;;  %v1272_v58 = vadd.f32 %v1271_v31, %v3322_v52  ;;  %v1430_v59 = vsel %vm1366_vm3, %v1266_v45, %v1398_v55 }
 0x2c0   : > { %v2673_v60 = vpop.eup %2672  ;;  %2686 = vrcp.f32 %v1801_v56  ;;  %v1273_v61 = vpop.f32.mrf.mxu0  ;;  %2542 = vmatprep.mubr.f32.mxu1 %v1430_v59 }
 0x2c1   : > { %v2675_v62 = vpop.eup %2674  ;;  %v1760_v63 = vmul.f32 1.442695, %v1710_v57  ;;  %v1399_v0 = vmul.f32 0.1, %v1272_v58  ;;  %v1274_v1 = vadd.f32 %v1273_v61, %v3324_v53  ;;  %1907 = vperm.xlu0 %2622, %v2673_v60   ;;  %vm1367_vm4 = vcmp.gt.f32.partialorder %v1272_v58, 0.0 }
 0x2c2   : > { %v1802_v2 = vadd.f32 1.0, %v2675_v62  ;;  %v1277_v3 = vpop.f32.mrf.mxu0 }
 0x2c3   : > { %2688 = vpow2.f32 %v1760_v63  ;;  %v1711_v4 = vsub.f32 0.0, %v1274_v1  ;;  %v1278_v5 = vadd.f32 %v1277_v3, %v3322_v52  ;;  %v1431_v6 = vsel %vm1367_vm4, %v1272_v58, %v1399_v0 }
 0x2c4   : > { %v2677_v7 = vpop.eup %2676  ;;  %2690 = vrcp.f32 %v1802_v2  ;;  %v1279_v8 = vpop.f32.mrf.mxu0  ;;  %2543 = vmatmul.mubr.f32.gmra.mxu1 %v1431_v6 }
 0x2c5   : > { %v2679_v9 = vpop.eup %2678  ;;  %v1762_v10 = vmul.f32 1.442695, %v1711_v4  ;;  %v1400_v11 = vmul.f32 0.1, %v1278_v5  ;;  %v1280_v12 = vadd.f32 %v1279_v8, %v3324_v53  ;;  %1912 = vperm.xlu1 %2623, %v2677_v7   ;;  %vm1368_vm5 = vcmp.gt.f32.partialorder %v1278_v5, 0.0 }
 0x2c6   : > { %v1803_v13 = vadd.f32 1.0, %v2679_v9  ;;  %v1283_v14 = vpop.f32.mrf.mxu0 }
 0x2c7   : > { %2692 = vpow2.f32 %v1762_v10  ;;  %v1712_v15 = vsub.f32 0.0, %v1280_v12  ;;  %v1284_v16 = vadd.f32 %v1283_v14, %v3322_v52  ;;  %v1432_v17 = vsel %vm1368_vm5, %v1278_v5, %v1400_v11 }
 0x2c8   : > { %v2681_v18 = vpop.eup %2680  ;;  %2694 = vrcp.f32 %v1803_v13  ;;  %v1285_v19 = vpop.f32.mrf.mxu0  ;;  %2545 = vmatprep.mubr.f32.mxu1 %v1432_v17 }
 0x2c9   : > { %v2683_v21 = vpop.eup %2682  ;;  %v1804_v22 = vadd.f32 1.0, %v2681_v18  ;;  %v1764_v23 = vmul.f32 1.442695, %v1712_v15  ;;  %v1401_v20 = vmul.f32 0.1, %v1284_v16  ;;  %v1286_v24 = vadd.f32 %v1285_v19, %v3324_v53 }
 0x2ca   : > { %1917 = vperm.xlu0 %2622, %v2683_v21   ;;  %v1289_v25 = vpop.f32.mrf.mxu0  ;;  %vm1369_vm6 = vcmp.gt.f32.partialorder %v1284_v16, 0.0 }
 0x2cb   : > { %2696 = vrcp.f32 %v1804_v22  ;;  %v1713_v27 = vsub.f32 0.0, %v1286_v24  ;;  %v1290_v28 = vadd.f32 %v1289_v25, %v3322_v52  ;;  %v1433_v29 = vsel %vm1369_vm6, %v1284_v16, %v1401_v20 }
 0x2cc   : > { %v2685_v32 = vpop.eup %2684  ;;  %2698 = vpow2.f32 %v1764_v23  ;;  %v1291_v33 = vpop.f32.mrf.mxu0  ;;  %2546 = vmatmul.mubr.f32.gmra.mxu1 %v1433_v29 }
 0x2cd   : > { %v2687_v34 = vpop.eup %2686  ;;  %v1805_v35 = vadd.f32 1.0, %v2685_v32  ;;  %v1766_v36 = vmul.f32 1.442695, %v1713_v27  ;;  %v1402_v30 = vmul.f32 0.1, %v1290_v28  ;;  %v1292_v37 = vadd.f32 %v1291_v33, %v3324_v53 }
 0x2ce   : > { %1922 = vperm.xlu1 %2623, %v2687_v34   ;;  %v1295_v38 = vpop.f32.mrf.mxu0  ;;  %vm1370_vm7 = vcmp.gt.f32.partialorder %v1290_v28, 0.0 }
 0x2cf   : > { %2700 = vrcp.f32 %v1805_v35  ;;  %v1714_v39 = vsub.f32 0.0, %v1292_v37  ;;  %v1296_v40 = vadd.f32 %v1295_v38, %v3322_v52  ;;  %v1434_v41 = vsel %vm1370_vm7, %v1290_v28, %v1402_v30 }
 0x2d0   : > { %v2689_v42 = vpop.eup %2688  ;;  %2702 = vpow2.f32 %v1766_v36  ;;  %v1297_v43 = vpop.f32.mrf.mxu0  ;;  %2548 = vmatprep.mubr.f32.mxu1 %v1434_v41 }
 0x2d1   : > { %v2691_v44 = vpop.eup %2690  ;;  %v1806_v46 = vadd.f32 1.0, %v2689_v42  ;;  %v1768_v45 = vmul.f32 1.442695, %v1714_v39  ;;  %v1403_v48 = vmul.f32 0.1, %v1296_v40  ;;  %v1298_v49 = vadd.f32 %v1297_v43, %v3324_v53 }
 0x2d2   : > { %1927 = vperm.xlu0 %2622, %v2691_v44   ;;  %v1301_v50 = vpop.f32.mrf.mxu0  ;;  %vm1371_vm8 = vcmp.gt.f32.partialorder %v1296_v40, 0.0 }
 0x2d3   : > { %2704 = vrcp.f32 %v1806_v46  ;;  %v1715_v51 = vsub.f32 0.0, %v1298_v49  ;;  %v1302_v54 = vadd.f32 %v1301_v50, %v3322_v52  ;;  %v1435_v55 = vsel %vm1371_vm8, %v1296_v40, %v1403_v48 }
 0x2d4   : > { %v2693_v26 = vpop.eup %2692  ;;  %2706 = vpow2.f32 %v1768_v45  ;;  %v1303_v56 = vpop.f32.mrf.mxu0  ;;  %2549 = vmatmul.mubr.f32.gmra.mxu1 %v1435_v55 }
 0x2d5   : > { %v2695_v31 = vpop.eup %2694  ;;  %v1807_v57 = vadd.f32 1.0, %v2693_v26  ;;  %v1770_v58 = vmul.f32 1.442695, %v1715_v51  ;;  %v1404_v59 = vmul.f32 0.1, %v1302_v54  ;;  %v1304_v60 = vadd.f32 %v1303_v56, %v3324_v53 }
 0x2d6   : > { %1932 = vperm.xlu1 %2623, %v2695_v31   ;;  %v1307_v61 = vpop.f32.mrf.mxu0  ;;  %vm1372_vm9 = vcmp.gt.f32.partialorder %v1302_v54, 0.0 }
 0x2d7   : > { %2708 = vrcp.f32 %v1807_v57  ;;  %v1716_v62 = vsub.f32 0.0, %v1304_v60  ;;  %v1308_v63 = vadd.f32 %v1307_v61, %v3322_v52  ;;  %v1436_v0 = vsel %vm1372_vm9, %v1302_v54, %v1404_v59 }
 0x2d8   : > { %v2697_v1 = vpop.eup %2696  ;;  %2710 = vpow2.f32 %v1770_v58  ;;  %v1309_v2 = vpop.f32.mrf.mxu0  ;;  %2551 = vmatprep.mubr.f32.mxu1 %v1436_v0 }
 0x2d9   : > { %v2699_v3 = vpop.eup %2698  ;;  %v1772_v4 = vmul.f32 1.442695, %v1716_v62  ;;  %v1405_v5 = vmul.f32 0.1, %v1308_v63  ;;  %v1310_v6 = vadd.f32 %v1309_v2, %v3324_v53  ;;  %1937 = vperm.xlu0 %2622, %v2697_v1   ;;  %vm1373_vm10 = vcmp.gt.f32.partialorder %v1308_v63, 0.0 }
 0x2da   : > { %v1808_v7 = vadd.f32 1.0, %v2699_v3  ;;  %v1313_v8 = vpop.f32.mrf.mxu0 }
 0x2db   : > { %2712 = vpow2.f32 %v1772_v4  ;;  %v1717_v9 = vsub.f32 0.0, %v1310_v6  ;;  %v1314_v10 = vadd.f32 %v1313_v8, %v3322_v52  ;;  %v1437_v11 = vsel %vm1373_vm10, %v1308_v63, %v1405_v5 }
 0x2dc   : > { %v2701_v12 = vpop.eup %2700  ;;  %2714 = vrcp.f32 %v1808_v7  ;;  %v1315_v13 = vpop.f32.mrf.mxu0  ;;  %2552 = vmatmul.mubr.f32.gmra.mxu1 %v1437_v11 }
 0x2dd   : > { %v2703_v14 = vpop.eup %2702  ;;  %v1774_v15 = vmul.f32 1.442695, %v1717_v9  ;;  %v1406_v16 = vmul.f32 0.1, %v1314_v10  ;;  %v1316_v17 = vadd.f32 %v1315_v13, %v3324_v53  ;;  %1942 = vperm.xlu1 %2623, %v2701_v12   ;;  %vm1374_vm11 = vcmp.gt.f32.partialorder %v1314_v10, 0.0 }
 0x2de   : > { %v1809_v18 = vadd.f32 1.0, %v2703_v14  ;;  %v1319_v19 = vpop.f32.mrf.mxu0 }
 0x2df   : > { %2716 = vpow2.f32 %v1774_v15  ;;  %v1718_v21 = vsub.f32 0.0, %v1316_v17  ;;  %v1320_v22 = vadd.f32 %v1319_v19, %v3322_v52  ;;  %v1438_v23 = vsel %vm1374_vm11, %v1314_v10, %v1406_v16 }
 0x2e0   : > { %v2705_v20 = vpop.eup %2704  ;;  %2718 = vrcp.f32 %v1809_v18  ;;  %v1321_v24 = vpop.f32.mrf.mxu0  ;;  %2554 = vmatprep.mubr.f32.mxu1 %v1438_v23 }
 0x2e1   : > { %v2707_v25 = vpop.eup %2706  ;;  %v1776_v27 = vmul.f32 1.442695, %v1718_v21  ;;  %v1407_v28 = vmul.f32 0.1, %v1320_v22  ;;  %v1322_v29 = vadd.f32 %v1321_v24, %v3324_v53  ;;  %1947 = vperm.xlu0 %2622, %v2705_v20   ;;  %vm1375_vm12 = vcmp.gt.f32.partialorder %v1320_v22, 0.0 }
 0x2e2   : > { %v1810_v32 = vadd.f32 1.0, %v2707_v25  ;;  %v1325_v33 = vpop.f32.mrf.mxu0 }
 0x2e3   : > { %2720 = vpow2.f32 %v1776_v27  ;;  %v1719_v34 = vsub.f32 0.0, %v1322_v29  ;;  %v1326_v35 = vadd.f32 %v1325_v33, %v3322_v52  ;;  %v1439_v36 = vsel %vm1375_vm12, %v1320_v22, %v1407_v28 }
 0x2e4   : > { %v2709_v30 = vpop.eup %2708  ;;  %2722 = vrcp.f32 %v1810_v32  ;;  %v1327_v37 = vpop.f32.mrf.mxu0  ;;  %2555 = vmatmul.mubr.f32.gmra.mxu1 %v1439_v36  ;;  %v3392_v36 = vand.u32 127, %v1081_v47 }
 0x2e5   : > { %v2711_v38 = vpop.eup %2710  ;;  %v1778_v39 = vmul.f32 1.442695, %v1719_v34  ;;  %v1408_v40 = vmul.f32 0.1, %v1326_v35  ;;  %v1328_v41 = vadd.f32 %v1327_v37, %v3324_v53  ;;  %1952 = vperm.xlu1 %2623, %v2709_v30   ;;  %vm1376_vm13 = vcmp.gt.f32.partialorder %v1326_v35, 0.0 }
 0x2e6   : > { %v1811_v42 = vadd.f32 1.0, %v2711_v38  ;;  %v1331_v43 = vpop.f32.mrf.mxu0  ;;  %v3399_v37 = vld [vmem:[%s3591_s8] ss:$0 sm:$0xff]  ;;  %vm1854_vm1 = vcmp.eq.s32.totalorder %v3392_v36, 10 }
 0x2e7   : > { %2724 = vpow2.f32 %v1778_v39  ;;  %v1720_v44 = vsub.f32 0.0, %v1328_v41  ;;  %v1332_v46 = vadd.f32 %v1331_v43, %v3322_v52  ;;  %v1440_v45 = vsel %vm1376_vm13, %v1326_v35, %v1408_v40 }
 0x2e8   : > { %v2713_v48 = vpop.eup %2712  ;;  %2726 = vrcp.f32 %v1811_v42  ;;  %v1333_v49 = vpop.f32.mrf.mxu0  ;;  %2557 = vmatprep.mubr.f32.mxu1 %v1440_v45 }
 0x2e9   : > { %v2715_v50 = vpop.eup %2714  ;;  %v1812_v51 = vadd.f32 1.0, %v2713_v48  ;;  %v1780_v54 = vmul.f32 1.442695, %v1720_v44  ;;  %v1409_v55 = vmul.f32 0.1, %v1332_v46  ;;  %v1334_v26 = vadd.f32 %v1333_v49, %v3324_v53 }
 0x2ea   : > { %1957 = vperm.xlu0 %2622, %v2715_v50   ;;  %v1337_v56 = vpop.f32.mrf.mxu0  ;;  %vm1377_vm14 = vcmp.gt.f32.partialorder %v1332_v46, 0.0 }
 0x2eb   : > { %2728 = vrcp.f32 %v1812_v51  ;;  %v1721_v31 = vsub.f32 0.0, %v1334_v26  ;;  %v1338_v57 = vadd.f32 %v1337_v56, %v3322_v52  ;;  %v1441_v58 = vsel %vm1377_vm14, %v1332_v46, %v1409_v55 }
 0x2ec   : > { %v2717_v59 = vpop.eup %2716  ;;  %2730 = vpow2.f32 %v1780_v54  ;;  %v1339_v60 = vpop.f32.mrf.mxu0  ;;  %2558 = vmatmul.mubr.f32.gmra.mxu1 %v1441_v58 }
 0x2ed   : > { %v2719_v61 = vpop.eup %2718  ;;  %v1813_v62 = vadd.f32 1.0, %v2717_v59  ;;  %v1782_v63 = vmul.f32 1.442695, %v1721_v31  ;;  %v1410_v0 = vmul.f32 0.1, %v1338_v57  ;;  %v1340_v1 = vadd.f32 %v1339_v60, %v3324_v53 }
 0x2ee   : > { %1962 = vperm.xlu1 %2623, %v2719_v61   ;;  %v1343_v2 = vpop.f32.mrf.mxu0  ;;  %vm1378_vm15 = vcmp.gt.f32.partialorder %v1338_v57, 0.0 }
 0x2ef   : > { %2732 = vrcp.f32 %v1813_v62  ;;  %v1722_v3 = vsub.f32 0.0, %v1340_v1  ;;  %v1344_v4 = vadd.f32 %v1343_v2, %v3322_v52  ;;  %v1442_v5 = vsel %vm1378_vm15, %v1338_v57, %v1410_v0 }
 0x2f0   : > { %v2721_v6 = vpop.eup %2720  ;;  %2734 = vpow2.f32 %v1782_v63  ;;  %v1345_v7 = vpop.f32.mrf.mxu0  ;;  %2560 = vmatprep.mubr.f32.mxu1 %v1442_v5 }
 0x2f1   : > { %v2723_v8 = vpop.eup %2722  ;;  %v1814_v9 = vadd.f32 1.0, %v2721_v6  ;;  %v1784_v10 = vmul.f32 1.442695, %v1722_v3  ;;  %v1411_v11 = vmul.f32 0.1, %v1344_v4  ;;  %v1346_v12 = vadd.f32 %v1345_v7, %v3324_v53 }
 0x2f2   : > { %1967 = vperm.xlu0 %2622, %v2723_v8   ;;  %vm1379_vm0 = vcmp.gt.f32.partialorder %v1344_v4, 0.0 }
 0x2f3   : > { %2736 = vrcp.f32 %v1814_v9  ;;  %v1723_v13 = vsub.f32 0.0, %v1346_v12  ;;  %v1443_v14 = vsel %vm1379_vm0, %v1344_v4, %v1411_v11 }
 0x2f4   : > { %v2725_v15 = vpop.eup %2724  ;;  %2738 = vpow2.f32 %v1784_v10  ;;  %2561 = vmatmul.mubr.f32.gmra.mxu1 %v1443_v14 }
 0x2f5   : > { %v2727_v52 = vpop.eup %2726  ;;  %v1815_v16 = vadd.f32 1.0, %v2725_v15  ;;  %v1786_v17 = vmul.f32 1.442695, %v1723_v13 }
 0x2f6   : > { %1972 = vperm.xlu1 %2623, %v2727_v52  }
 0x2f7   : > { %2740 = vrcp.f32 %v1815_v16 }
 0x2f8   : > { %v2729_v18 = vpop.eup %2728  ;;  %2742 = vpow2.f32 %v1786_v17 }
 0x2f9   : > { %v2731_v19 = vpop.eup %2730  ;;  %1977 = vperm.xlu0 %2622, %v2729_v18  }
 0x2fa   : > { %v1816_v21 = vadd.f32 1.0, %v2731_v19 }
 0x2fc   : > { %v2733_v22 = vpop.eup %2732  ;;  %2744 = vrcp.f32 %v1816_v21 }
 0x2fd   : > { %v2735_v53 = vpop.eup %2734  ;;  %1982 = vperm.xlu1 %2623, %v2733_v22  }
 0x2fe   : > { %v1817_v23 = vadd.f32 1.0, %v2735_v53 }
 0x300   : > { %v2737_v20 = vpop.eup %2736  ;;  %2746 = vrcp.f32 %v1817_v23 }
 0x301   : > { %v2739_v24 = vpop.eup %2738  ;;  %1987 = vperm.xlu0 %2622, %v2737_v20  }
 0x302   : > { %v1818_v25 = vadd.f32 1.0, %v2739_v24 }
 0x304   : > { %v2741_v27 = vpop.eup %2740  ;;  %2748 = vrcp.f32 %v1818_v25 }
 0x305   : > { %v2743_v28 = vpop.eup %2742  ;;  %1992 = vperm.xlu1 %2623, %v2741_v27  }
 0x306   : > { %v1819_v29 = vadd.f32 1.0, %v2743_v28 }
 0x308   : > { %2750 = vrcp.f32 %v1819_v29 }
 0x309   : > { %v2745_v32 = vpop.eup %2744 }
 0x30a   : > { %1997 = vperm.xlu0 %2622, %v2745_v32  }
 0x30d   : > { %v2747_v33 = vpop.eup %2746 }
 0x30e   : > { %2002 = vperm.xlu1 %2623, %v2747_v33  }
 0x311   : > { %v2749_v34 = vpop.eup %2748 }
 0x312   : > { %2007 = vperm.xlu0 %2622, %v2749_v34  }
 0x314   : > { %v1858_v30 = vpop.permute.xlu0 %1857 }
 0x315   : > { %v2751_v35 = vpop.eup %2750 }
 0x316   : > { %2012 = vperm.xlu1 %2623, %v2751_v35  }
 0x318   : > { %v1863_v40 = vpop.permute.xlu0 %1862 }
 0x31c   : > { %v1868_v43 = vpop.permute.xlu1 %1867 }
 0x320   : > { %v1873_v48 = vpop.permute.xlu1 %1872 }
 0x325   : > { %v1878_v59 = vpop.permute.xlu0 %1877 }
 0x329   : > { %v1883_v56 = vpop.permute.xlu1 %1882 }
 0x32d   : > { %v1888_v3 = vpop.permute.xlu0 %1887 }
 0x331   : > { %v1893_v63 = vpop.permute.xlu1 %1892 }
 0x334   : > { %v1898_v11 = vpop.permute.xlu0 %1897 }
 0x338   : > { %v1903_v7 = vpop.permute.xlu1 %1902 }
 0x33c   : > { %v2517_v38 = vpop.f32.mrf.mxu1  ;;  %v1908_v18 = vpop.permute.xlu0 %1907 }
 0x33d   : > { %v1539_v39 = vadd.f32 %v2517_v38, %v3399_v37 }
 0x33e   : > { %v1533_v41 = vpop.f32.mrf.mxu1 }
 0x33f   : > { %v2016_v42 = vsel %vm1854_vm1, %v1863_v40, %v1539_v39  ;;  %v1534_v47 = vadd.f32 %v3399_v37, %v1533_v41 }
 0x340   : > { %2048 = vst [vmem:[%s3406_s23 + $0x8] sm:$0xff] %v2016_v42  ;;  %v1913_v15 = vpop.permute.xlu1 %1912 }
 0x341   : > { %v2015_v44 = vsel %vm1854_vm1, %v1858_v30, %v1534_v47 }
 0x342   : > { %2047 = vst [vmem:[%s3406_s23] sm:$0xff] %v2015_v44 }
 0x344   : > { %v2520_v46 = vpop.f32.mrf.mxu1 }
 0x345   : > { %v1549_v45 = vadd.f32 %v2520_v46, %v3399_v37  ;;  %v1918_v25 = vpop.permute.xlu0 %1917 }
 0x346   : > { %v1543_v49 = vpop.f32.mrf.mxu1 }
 0x347   : > { %v2018_v50 = vsel %vm1854_vm1, %v1873_v48, %v1549_v45  ;;  %v1544_v51 = vadd.f32 %v3399_v37, %v1543_v49 }
 0x348   : > { %2050 = vst [vmem:[%s3406_s23 + $0x18] sm:$0xff] %v2018_v50 }
 0x349   : > { %v2017_v54 = vsel %vm1854_vm1, %v1868_v43, %v1544_v51  ;;  %v1923_v53 = vpop.permute.xlu1 %1922 }
 0x34a   : > { %2049 = vst [vmem:[%s3406_s23 + $0x10] sm:$0xff] %v2017_v54 }
 0x34c   : > { %v2523_v55 = vpop.f32.mrf.mxu1 }
 0x34d   : > { %v1559_v26 = vadd.f32 %v2523_v55, %v3399_v37  ;;  %v1928_v30 = vpop.permute.xlu0 %1927 }
 0x34e   : > { %v1553_v31 = vpop.f32.mrf.mxu1 }
 0x34f   : > { %v2020_v57 = vsel %vm1854_vm1, %v1883_v56, %v1559_v26  ;;  %v1554_v58 = vadd.f32 %v3399_v37, %v1553_v31 }
 0x350   : > { %2052 = vst [vmem:[%s3406_s23 + $0x28] sm:$0xff] %v2020_v57 }
 0x351   : > { %v2019_v60 = vsel %vm1854_vm1, %v1878_v59, %v1554_v58  ;;  %v1933_v32 = vpop.permute.xlu1 %1932 }
 0x352   : > { %2051 = vst [vmem:[%s3406_s23 + $0x20] sm:$0xff] %v2019_v60 }
 0x354   : > { %v2526_v61 = vpop.f32.mrf.mxu1  ;;  %v1938_v44 = vpop.permute.xlu0 %1937 }
 0x355   : > { %v1569_v62 = vadd.f32 %v2526_v61, %v3399_v37 }
 0x356   : > { %v1563_v0 = vpop.f32.mrf.mxu1 }
 0x357   : > { %v2022_v1 = vsel %vm1854_vm1, %v1893_v63, %v1569_v62  ;;  %v1564_v2 = vadd.f32 %v3399_v37, %v1563_v0 }
 0x358   : > { %2054 = vst [vmem:[%s3406_s23 + $0x38] sm:$0xff] %v2022_v1  ;;  %v1943_v41 = vpop.permute.xlu1 %1942 }
 0x359   : > { %v2021_v4 = vsel %vm1854_vm1, %v1888_v3, %v1564_v2 }
 0x35a   : > { %2053 = vst [vmem:[%s3406_s23 + $0x30] sm:$0xff] %v2021_v4 }
 0x35c   : > { %v2529_v5 = vpop.f32.mrf.mxu1  ;;  %v1948_v55 = vpop.permute.xlu0 %1947 }
 0x35d   : > { %v1579_v6 = vadd.f32 %v2529_v5, %v3399_v37 }
 0x35e   : > { %v1573_v8 = vpop.f32.mrf.mxu1 }
 0x35f   : > { %v2024_v9 = vsel %vm1854_vm1, %v1903_v7, %v1579_v6  ;;  %v1574_v10 = vadd.f32 %v3399_v37, %v1573_v8 }
 0x360   : > { %2056 = vst [vmem:[%s3406_s23 + $0x48] sm:$0xff] %v2024_v9  ;;  %v1953_v49 = vpop.permute.xlu1 %1952 }
 0x361   : > { %v2023_v12 = vsel %vm1854_vm1, %v1898_v11, %v1574_v10 }
 0x362   : > { %2055 = vst [vmem:[%s3406_s23 + $0x40] sm:$0xff] %v2023_v12 }
 0x364   : > { %v2532_v13 = vpop.f32.mrf.mxu1 }
 0x365   : > { %v1589_v14 = vadd.f32 %v2532_v13, %v3399_v37  ;;  %v1958_v61 = vpop.permute.xlu0 %1957 }
 0x366   : > { %v1583_v52 = vpop.f32.mrf.mxu1 }
 0x367   : > { %v2026_v16 = vsel %vm1854_vm1, %v1913_v15, %v1589_v14  ;;  %v1584_v17 = vadd.f32 %v3399_v37, %v1583_v52 }
 0x368   : > { %2058 = vst [vmem:[%s3406_s23 + $0x58] sm:$0xff] %v2026_v16 }
 0x369   : > { %v2025_v19 = vsel %vm1854_vm1, %v1908_v18, %v1584_v17  ;;  %v1963_v57 = vpop.permute.xlu1 %1962 }
 0x36a   : > { %2057 = vst [vmem:[%s3406_s23 + $0x50] sm:$0xff] %v2025_v19 }
 0x36c   : > { %v2535_v21 = vpop.f32.mrf.mxu1 }
 0x36d   : > { %v1599_v22 = vadd.f32 %v2535_v21, %v3399_v37  ;;  %v1968_v5 = vpop.permute.xlu0 %1967 }
 0x36e   : > { %v1593_v23 = vpop.f32.mrf.mxu1 }
 0x36f   : > { %v2028_v20 = vsel %vm1854_vm1, %v1923_v53, %v1599_v22  ;;  %v1594_v24 = vadd.f32 %v3399_v37, %v1593_v23 }
 0x370   : > { %2060 = vst [vmem:[%s3406_s23 + $0x68] sm:$0xff] %v2028_v20 }
 0x371   : > { %v2027_v27 = vsel %vm1854_vm1, %v1918_v25, %v1594_v24  ;;  %v1973_v1 = vpop.permute.xlu1 %1972 }
 0x372   : > { %2059 = vst [vmem:[%s3406_s23 + $0x60] sm:$0xff] %v2027_v27 }
 0x374   : > { %v2538_v28 = vpop.f32.mrf.mxu1  ;;  %v1978_v13 = vpop.permute.xlu0 %1977 }
 0x375   : > { %v1609_v29 = vadd.f32 %v2538_v28, %v3399_v37 }
 0x376   : > { %v1603_v33 = vpop.f32.mrf.mxu1 }
 0x377   : > { %v2030_v34 = vsel %vm1854_vm1, %v1933_v32, %v1609_v29  ;;  %v1604_v35 = vadd.f32 %v3399_v37, %v1603_v33 }
 0x378   : > { %2062 = vst [vmem:[%s3406_s23 + $0x78] sm:$0xff] %v2030_v34  ;;  %v1983_v9 = vpop.permute.xlu1 %1982 }
 0x379   : > { %v2029_v38 = vsel %vm1854_vm1, %v1928_v30, %v1604_v35 }
 0x37a   : > { %2061 = vst [vmem:[%s3406_s23 + $0x70] sm:$0xff] %v2029_v38 }
 0x37c   : > { %v2541_v39 = vpop.f32.mrf.mxu1  ;;  %v1988_v21 = vpop.permute.xlu0 %1987 }
 0x37d   : > { %v1619_v40 = vadd.f32 %v2541_v39, %v3399_v37 }
 0x37e   : > { %v1613_v42 = vpop.f32.mrf.mxu1 }
 0x37f   : > { %v2032_v47 = vsel %vm1854_vm1, %v1943_v41, %v1619_v40  ;;  %v1614_v43 = vadd.f32 %v3399_v37, %v1613_v42 }
 0x380   : > { %2064 = vst [vmem:[%s3406_s23 + $0x88] sm:$0xff] %v2032_v47  ;;  %v1993_v16 = vpop.permute.xlu1 %1992 }
 0x381   : > { %v2031_v46 = vsel %vm1854_vm1, %v1938_v44, %v1614_v43 }
 0x382   : > { %2063 = vst [vmem:[%s3406_s23 + $0x80] sm:$0xff] %v2031_v46 }
 0x384   : > { %v2544_v45 = vpop.f32.mrf.mxu1 }
 0x385   : > { %v1629_v48 = vadd.f32 %v2544_v45, %v3399_v37  ;;  %v1998_v28 = vpop.permute.xlu0 %1997 }
 0x386   : > { %v1623_v50 = vpop.f32.mrf.mxu1 }
 0x387   : > { %v2034_v51 = vsel %vm1854_vm1, %v1953_v49, %v1629_v48  ;;  %v1624_v54 = vadd.f32 %v3399_v37, %v1623_v50 }
 0x388   : > { %2066 = vst [vmem:[%s3406_s23 + $0x98] sm:$0xff] %v2034_v51 }
 0x389   : > { %v2033_v26 = vsel %vm1854_vm1, %v1948_v55, %v1624_v54  ;;  %v2003_v20 = vpop.permute.xlu1 %2002 }
 0x38a   : > { %2065 = vst [vmem:[%s3406_s23 + $0x90] sm:$0xff] %v2033_v26 }
 0x38c   : > { %v2547_v56 = vpop.f32.mrf.mxu1 }
 0x38d   : > { %v1639_v31 = vadd.f32 %v2547_v56, %v3399_v37  ;;  %v2008_v39 = vpop.permute.xlu0 %2007 }
 0x38e   : > { %v1633_v58 = vpop.f32.mrf.mxu1 }
 0x38f   : > { %v2036_v59 = vsel %vm1854_vm1, %v1963_v57, %v1639_v31  ;;  %v1634_v60 = vadd.f32 %v3399_v37, %v1633_v58 }
 0x390   : > { %2068 = vst [vmem:[%s3406_s23 + $0xa8] sm:$0xff] %v2036_v59 }
 0x391   : > { %v2035_v62 = vsel %vm1854_vm1, %v1958_v61, %v1634_v60  ;;  %v2013_v34 = vpop.permute.xlu1 %2012 }
 0x392   : > { %2067 = vst [vmem:[%s3406_s23 + $0xa0] sm:$0xff] %v2035_v62 }
 0x394   : > { %v2550_v63 = vpop.f32.mrf.mxu1 }
 0x395   : > { %v1649_v0 = vadd.f32 %v2550_v63, %v3399_v37 }
 0x396   : > { %v1643_v2 = vpop.f32.mrf.mxu1 }
 0x397   : > { %v2038_v3 = vsel %vm1854_vm1, %v1973_v1, %v1649_v0  ;;  %v1644_v4 = vadd.f32 %v3399_v37, %v1643_v2 }
 0x398   : > { %2070 = vst [vmem:[%s3406_s23 + $0xb8] sm:$0xff] %v2038_v3 }
 0x399   : > { %v2037_v6 = vsel %vm1854_vm1, %v1968_v5, %v1644_v4 }
 0x39a   : > { %2069 = vst [vmem:[%s3406_s23 + $0xb0] sm:$0xff] %v2037_v6 }
 0x39c   : > { %v2553_v7 = vpop.f32.mrf.mxu1 }
 0x39d   : > { %v1659_v8 = vadd.f32 %v2553_v7, %v3399_v37 }
 0x39e   : > { %v1653_v10 = vpop.f32.mrf.mxu1 }
 0x39f   : > { %v2040_v11 = vsel %vm1854_vm1, %v1983_v9, %v1659_v8  ;;  %v1654_v12 = vadd.f32 %v3399_v37, %v1653_v10 }
 0x3a0   : > { %2072 = vst [vmem:[%s3406_s23 + $0xc8] sm:$0xff] %v2040_v11 }
 0x3a1   : > { %v2039_v14 = vsel %vm1854_vm1, %v1978_v13, %v1654_v12 }
 0x3a2   : > { %2071 = vst [vmem:[%s3406_s23 + $0xc0] sm:$0xff] %v2039_v14 }
 0x3a4   : > { %v2556_v15 = vpop.f32.mrf.mxu1 }
 0x3a5   : > { %v1669_v52 = vadd.f32 %v2556_v15, %v3399_v37 }
 0x3a6   : > { %v1663_v17 = vpop.f32.mrf.mxu1 }
 0x3a7   : > { %v2042_v18 = vsel %vm1854_vm1, %v1993_v16, %v1669_v52  ;;  %v1664_v19 = vadd.f32 %v3399_v37, %v1663_v17 }
 0x3a8   : > { %2074 = vst [vmem:[%s3406_s23 + $0xd8] sm:$0xff] %v2042_v18 }
 0x3a9   : > { %v2041_v22 = vsel %vm1854_vm1, %v1988_v21, %v1664_v19 }
 0x3aa   : > { %2073 = vst [vmem:[%s3406_s23 + $0xd0] sm:$0xff] %v2041_v22 }
 0x3ac   : > { %v2559_v53 = vpop.f32.mrf.mxu1 }
 0x3ad   : > { %v1679_v23 = vadd.f32 %v2559_v53, %v3399_v37 }
 0x3ae   : > { %v1673_v24 = vpop.f32.mrf.mxu1 }
 0x3af   : > { %v2044_v25 = vsel %vm1854_vm1, %v2003_v20, %v1679_v23  ;;  %v1674_v27 = vadd.f32 %v3399_v37, %v1673_v24 }
 0x3b0   : > { %2076 = vst [vmem:[%s3406_s23 + $0xe8] sm:$0xff] %v2044_v25 }
 0x3b1   : > { %v2043_v29 = vsel %vm1854_vm1, %v1998_v28, %v1674_v27 }
 0x3b2   : > { %2075 = vst [vmem:[%s3406_s23 + $0xe0] sm:$0xff] %v2043_v29 }
 0x3b4   : > { %v2562_v32 = vpop.f32.mrf.mxu1 }
 0x3b5   : > { %v1689_v33 = vadd.f32 %v2562_v32, %v3399_v37 }
 0x3b6   : > { %v1683_v35 = vpop.f32.mrf.mxu1 }
 0x3b7   : > { %v2046_v30 = vsel %vm1854_vm1, %v2013_v34, %v1689_v33  ;;  %v1684_v38 = vadd.f32 %v3399_v37, %v1683_v35 }
 0x3b8   : > { %2078 = vst [vmem:[%s3406_s23 + $0xf8] sm:$0xff] %v2046_v30 }
 0x3b9   : > { %v2045_v40 = vsel %vm1854_vm1, %v2008_v39, %v1684_v38 }
 0x3ba   : > { %2077 = vst [vmem:[%s3406_s23 + $0xf0] sm:$0xff] %v2045_v40 }
 0x3bb   : > { %2765 = shalt.err (!%p2762_p3)
}
 0x3bc   : > { %s2766_s22 = scalar_lea.hbm %s3533_s16, 4096  ;;  %s2770_s27 = scalar_lea.hbm %s3592_s9, 8192 }
 0x3bd   : > { %p2767_p4 = scmp.ne.s32.totalorder %s3533_s16, %s2766_s22  ;;  %p2771_p9 = scmp.lt.s32.totalorder %s3533_s16, %s3592_s9 }
 0x3be   : > { %p2772_p10 = scmp.lt.s32.totalorder %s2770_s27, %s2766_s22 }
 0x3bf   : > { %p2768_p7 = pnand %p2767_p4, %p2907_p5 }
 0x3c0   : > { %p2773_p11 = por %p2772_p10, %p2771_p9 }
 0x3c1   : > { %p2769_p8 = pneg %p2768_p7 }
 0x3c3   : > { %p2774_p12 = pnand %p2773_p11, %p2769_p8 }
 0x3c5   : > { %2777 = shalt.err (!%p2774_p12)
}
 0x3c6   : > { %s2817_s17 = smov 128   ;;  %s2818_s21 = smov 8  }
 0x3c7   : > { %2579 = dma.vmem_to_hbm [thread:$0]  (%p2907_p5), %s3535_s28, 4096, %s3533_s16, %s3543_s13, %s2817_s17, %s2817_s17, %s2818_s21  }
 0x3c8 PF: > { %p2585_p13 = scmp.ge.s32.totalorder %s2812_s12, 2  ;;  %s2108_s24 = sand.u32 1, %s2800_s30  }
 0x3c9   : > { %s2109_s25 = scalar_lea.sflag [#allocation3], %s2108_s24 }
 0x3ca   : > { %p2582_p0 = pnand %p2585_p13, %p2911_p6 }
 0x3cc   : > { %p2583_p1 = pneg %p2582_p0 }
 0x3ce   : > { %2795 = dma.done.wait (%p2583_p1), %s2109_s25, 4096  }
 0x3cf   : > { %2797 = vsyncadd (%p2583_p1), %s2109_s25, 4294963200  ;;  %p19_p2 = scmp.ge.s32.totalorder %s2894_s15, 4   ;;  %s3595_s30 = smov %s2804_s10 }
 0x3d0   : > { %s3596_s10 = smov %s2808_s11  ;;  %s3597_s11 = smov %s2905_s18 }
 0x3d1   : > { %s3598_s12 = smov %s2894_s15  ;;  %21 = sbr.rel (!%p19_p2) target bundleno = 3 (0x3), region = 91 }
 0x3d6   :  { %2114 = vsyncpa [#allocation3], 1 }
 0x3d7   :  { %2116 = vsyncpa [#allocation3 + $0x1], 1 }

</bundles_post_ra>
